<compile_context>
chip_gen: v7x
topology: tpu7x:2x2x1
jax: 0.10.0
libtpu: 0.0.40
codegen_flags: <defaults>
</compile_context>

<pallas_src>
import math
import functools

import jax
import jax.numpy as jnp
from jax.experimental import pallas as pl
from jax.experimental.pallas import tpu as pltpu


# ----------------------------------------------------------------------------
# Fused kernel body. Grid = (batch, head); head axis is "arbitrary".
# ----------------------------------------------------------------------------
def _fused_attn_kernel(x_ref, wqkv_ref, bqkv_ref, wproj_ref, bproj_ref,
                       out_ref, kv_ref, qkv_s, o_s,
                       *, head, k_d, matmul_dtype, approx_recip):
    h = pl.program_id(1)
    T = x_ref.shape[1]
    D = head * k_d

    # ---- phase 0 (h == 0): fused lane-dense QKV projection, once per batch ----
    @pl.when(h == 0)
    def _():
        x = x_ref[0]                                                    # (T, D)
        qkv = jnp.dot(x.astype(matmul_dtype),
                      wqkv_ref[...].astype(matmul_dtype),
                      preferred_element_type=jnp.float32) + bqkv_ref[...]  # (T, 3D) f32

        # `present` written lane-dense in one shot:
        #   present[0] = keys   (columns 2D:3D of qkv)
        #   present[1] = values (columns  0:D  of qkv)
        # The per-head (2,B,H,T,k_d) torch layout is recovered by a wrapper
        # reshape/transpose (layout plumbing, outside the kernel).
        kv_ref[0, 0] = qkv[:, 2 * D:3 * D].astype(kv_ref.dtype)
        kv_ref[1, 0] = qkv[:, 0:D].astype(kv_ref.dtype)

        # Park per-head V | Q | K slabs in VMEM scratch (matmul dtype). torch's
        # split order along the 3D axis is V | Q | K. Q is pre-scaled by
        # 1/sqrt(k_d) here ((T,k_d) multiply per head) instead of scaling the
        # (T,T) score matrix later.
        scale = 1.0 / math.sqrt(k_d)
        for i in range(head):                                 # static, once per batch
            qkv_s[0, i] = qkv[:, i * k_d:(i + 1) * k_d].astype(qkv_s.dtype)
            qkv_s[1, i] = (qkv[:, D + i * k_d:D + (i + 1) * k_d]
                           * scale).astype(qkv_s.dtype)
            qkv_s[2, i] = qkv[:, 2 * D + i * k_d:
                              2 * D + (i + 1) * k_d].astype(qkv_s.dtype)

    # ---- per-head causal attention for this grid step's head ----
    # TODO(synk): for long sequences (T >~ 2K, esp. v7x's 64 MiB VMEM) add a
    # query-tile grid axis with online softmax (flash style) instead of the
    # full (T,T) score tile per head.
    v = qkv_s[0, h]                                                     # (T, k_d)
    q = qkv_s[1, h]                                                     # pre-scaled
    k = qkv_s[2, h]

    s = jax.lax.dot_general(q, k,
                            dimension_numbers=(((1,), (1,)), ((), ())),
                            preferred_element_type=jnp.float32)         # (T, T)
    row = jax.lax.broadcasted_iota(jnp.int32, (T, T), 0)
    col = jax.lax.broadcasted_iota(jnp.int32, (T, T), 1)
    s = jnp.where(col <= row, s, -1.0e10)

    # softmax kept in f32 (v5e VPU/EUP have no bf16)
    s = s - jnp.max(s, axis=-1, keepdims=True)
    p = jnp.exp(s)
    denom = jnp.sum(p, axis=-1, keepdims=True)
    if approx_recip:
        p = p * pl.reciprocal(denom, approx=True)        # EUP slot (bf16 mode)
    else:
        p = p / denom                                    # exact (f32 path)

    o_h = jnp.dot(p.astype(matmul_dtype), v,
                  preferred_element_type=jnp.float32)                    # (T, k_d)
    o_s[h] = o_h.astype(o_s.dtype)

    # ---- phase 2 (h == last): ONE full-K c_proj matmul, lane-dense out ----
    @pl.when(h == head - 1)
    def _():
        o_all = jnp.concatenate(
            [o_s[i] for i in range(head - 1)] + [o_h.astype(o_s.dtype)],
            axis=-1)                                                     # (T, D)
        out = jnp.dot(o_all, wproj_ref[...].astype(matmul_dtype),
                      preferred_element_type=jnp.float32) + bproj_ref[...]
        out_ref[0] = out.astype(out_ref.dtype)


# ----------------------------------------------------------------------------
# VMEM budget estimate (weights counted with their actual buffer count).
# ----------------------------------------------------------------------------
def _estimate_vmem_bytes(T, D, head, k_d, matmul_dtype, weight_bufs):
    f32 = 4
    mdt = 2 if matmul_dtype == jnp.bfloat16 else 4
    lane, sub = 128, 8
    t_p = -(-T // sub) * sub
    d_p = -(-D // lane) * lane
    d3_p = -(-(3 * D) // lane) * lane
    kd_p = -(-k_d // lane) * lane
    d_rows = -(-D // sub) * sub

    x_io = 2 * t_p * d_p * f32                                   # x, double buffered
    w_io = weight_bufs * (d_rows * d3_p + sub * d3_p
                          + d_rows * d_p + sub * d_p) * f32      # weights + biases
    out_io = 2 * (t_p * d_p + 2 * t_p * d_p) * f32               # out + present, dbl buf
    scratch = (3 * head + head) * t_p * kd_p * mdt               # qkv_s + o_s
    temps = (t_p * d3_p + 3 * t_p * t_p + 2 * t_p * d_p) * f32   # qkv / scores / o_all
    return x_io + w_io + out_io + scratch + 2 * temps            # 2x headroom on temps


def _build_call(B, T, D, head, k_d, matmul_dtype, single_buffer_weights):
    def const_spec(shape):
        idx_map = lambda b, h: (0,) * len(shape)
        if single_buffer_weights:
            # constant index_map -> never re-DMA'd; request a single buffer so
            # the second (unused) weight buffer's VMEM is reclaimed.
            return pl.BlockSpec(shape, idx_map, pipeline_mode=pl.Buffered(1))
        return pl.BlockSpec(shape, idx_map)

    weight_bufs = 1 if single_buffer_weights else 2
    est = _estimate_vmem_bytes(T, D, head, k_d, matmul_dtype, weight_bufs)
    try:
        vmem_cap = int(pltpu.get_tpu_info().vmem_capacity_bytes)
    except Exception:
        vmem_cap = 128 * 1024 * 1024
    # generation-aware: ~109 MiB on v5e/v6e (128 MiB), ~54 MiB on v7x (64 MiB)
    vmem_limit = int(min(max(est, 32 * 1024 * 1024), int(0.85 * vmem_cap)))

    kernel = functools.partial(
        _fused_attn_kernel, head=head, k_d=k_d, matmul_dtype=matmul_dtype,
        approx_recip=(matmul_dtype != jnp.float32))

    return pl.pallas_call(
        kernel,
        out_shape=(
            jax.ShapeDtypeStruct((B, T, D), jnp.float32),        # out
            jax.ShapeDtypeStruct((2, B, T, D), jnp.float32),     # present (lane-dense)
        ),
        grid_spec=pltpu.PrefetchScalarGridSpec(
            num_scalar_prefetch=0,
            grid=(B, head),
            in_specs=[
                pl.BlockSpec((1, T, D), lambda b, h: (b, 0, 0)),     # x
                const_spec((D, 3 * D)),                              # w_attn
                const_spec((1, 3 * D)),                              # b_attn
                const_spec((D, D)),                                  # w_proj
                const_spec((1, D)),                                  # b_proj
            ],
            out_specs=(
                pl.BlockSpec((1, T, D), lambda b, h: (b, 0, 0)),           # out
                pl.BlockSpec((2, 1, T, D), lambda b, h: (0, b, 0, 0)),     # present
            ),
            scratch_shapes=[
                pltpu.VMEM((3, head, T, k_d), matmul_dtype),   # V|Q|K per-head slabs
                pltpu.VMEM((head, T, k_d), matmul_dtype),      # per-head attn outputs
            ],
        ),
        compiler_params=pltpu.CompilerParams(
            dimension_semantics=("parallel", "arbitrary"),
            vmem_limit_bytes=vmem_limit),
    )


def sliding_window_attention(x, params, head, *, matmul_dtype=jnp.float32):
    """Pallas forward pass; returns (out, present) like the torch module.

    layer_past is not supported (the reference test path uses layer_past=None).
    matmul_dtype=jnp.bfloat16 enables bf16 MXU inputs (f32 accumulation and f32
    softmax) -- the recommended throughput mode on v6e/v7x.
    """
    B, T, D = x.shape
    assert D % head == 0
    k_d = D // head
    # TODO(synk): `context` (sliding window size) is stored but unused in the
    # reference forward, so no windowing is applied here either.

    w_attn = params["w_attn"]                        # (D, 3D); x @ w_attn + b
    b_attn = params["b_attn"].reshape(1, 3 * D)      # (1, 3D)
    w_proj = params["w_proj"]                        # (D, D)
    b_proj = params["b_proj"].reshape(1, D)          # (1, D)

    def run(single_buffer_weights):
        fn = _build_call(B, T, D, head, k_d, matmul_dtype, single_buffer_weights)
        out, kv = fn(x, w_attn, b_attn, w_proj, b_proj)
        return jax.block_until_ready(out), jax.block_until_ready(kv)

    try:
        out, kv = run(single_buffer_weights=True)
    except Exception:
        # TODO(synk): pl.Buffered(1) single-buffering of the constant weight
        # blocks is unsupported on this jax version; fall back to defaults.
        out, kv = run(single_buffer_weights=False)

    # kv is the lane-dense (2, B, T, D) slab written by the kernel; recover the
    # torch `present` layout (2, B, H, T, k_d) with a wrapper-side reshape.
    present = kv.reshape(2, B, T, head, k_d).transpose(0, 1, 3, 2, 4)
    return out, present


# ----------------------------------------------------------------------------
# Pure-JAX reference (mirrors the torch module) for correctness checks.
# ----------------------------------------------------------------------------
def reference(x, params, head):
    B, T, D = x.shape
    k_d = D // head
    qkv = x @ params["w_attn"] + params["b_attn"]
    v, q, k = qkv[..., :D], qkv[..., D:2 * D], qkv[..., 2 * D:]

    def split(t):
        return t.reshape(B, T, head, k_d).transpose(0, 2, 1, 3)

    v, q, k = split(v), split(q), split(k)
    s = jnp.einsum("bhqd,bhkd->bhqk", q, k) / math.sqrt(k_d)
    m = jnp.tril(jnp.ones((T, T), jnp.float32))
    s = s * m - 1.0e10 * (1.0 - m)
    p = jax.nn.softmax(s, axis=-1)
    o = jnp.einsum("bhqk,bhkd->bhqd", p, v).transpose(0, 2, 1, 3).reshape(B, T, D)
    out = o @ params["w_proj"] + params["b_proj"]
    present = jnp.stack((k, v))
    return out, present


if __name__ == "__main__":
    # small shapes consistent with the module
    B, T, d_model, head = 2, 8, 32, 4
    context = 4   # unused by the reference forward (see TODO above)

    key = jax.random.PRNGKey(0)
    k1, k2, k3, k4, k5 = jax.random.split(key, 5)
    params = {
        "w_attn": 0.05 * jax.random.normal(k1, (d_model, 3 * d_model), jnp.float32),
        "b_attn": 0.01 * jax.random.normal(k2, (3 * d_model,), jnp.float32),
        "w_proj": 0.05 * jax.random.normal(k3, (d_model, d_model), jnp.float32),
        "b_proj": 0.01 * jax.random.normal(k4, (d_model,), jnp.float32),
    }
    x = jax.random.normal(k5, (B, T, d_model), jnp.float32)

    out_ref, present_ref = reference(x, params, head)

    # f32 path (exact softmax division)
    out, present = sliding_window_attention(x, params, head)
    out = jax.block_until_ready(out)
    present = jax.block_until_ready(present)
    assert jnp.allclose(out, out_ref, atol=5e-4, rtol=5e-4)
    assert jnp.allclose(present, present_ref, atol=1e-4, rtol=1e-4)

    # bf16-matmul path (v5e/v6e/v7x throughput mode); looser tolerance.
    out_bf, present_bf = sliding_window_attention(
        x, params, head, matmul_dtype=jnp.bfloat16)
    out_bf = jax.block_until_ready(out_bf)
    present_bf = jax.block_until_ready(present_bf)
    assert jnp.allclose(out_bf, out_ref, atol=3e-2, rtol=3e-2)
    assert jnp.allclose(present_bf, present_ref, atol=3e-2, rtol=3e-2)

    print("KERNEL_OK")
</pallas_src>

<mosaic_0001>
module attributes {stable_mosaic.version = 11 : i64} {
  func.func @_fused_attn_kernel(%arg0: i32, %arg1: i32, %arg2: memref<1x8x32xf32, #tpu.memory_space<vmem>>, %arg3: memref<32x96xf32, #tpu.memory_space<vmem>>, %arg4: memref<1x96xf32, #tpu.memory_space<vmem>>, %arg5: memref<32x32xf32, #tpu.memory_space<vmem>>, %arg6: memref<1x32xf32, #tpu.memory_space<vmem>>, %arg7: memref<1x8x32xf32, #tpu.memory_space<vmem>>, %arg8: memref<2x1x8x32xf32, #tpu.memory_space<vmem>>, %arg9: memref<3x4x8x8xf32, #tpu.memory_space<vmem>>, %arg10: memref<4x8x8xf32, #tpu.memory_space<vmem>>) attributes {dimension_semantics = [#tpu.dimension_semantics<parallel>, #tpu.dimension_semantics<arbitrary>], iteration_bounds = array<i64: 2, 4>, scalar_prefetch = 0 : i64, scratch_operands = 2 : i64, tpu.core_type = #tpu.core_type<tc>, window_params = [{transform_indices = @transform_0, window_bounds = array<i64: 1, 8, 32>}, {pipeline_mode = #tpu.pipeline_mode<synchronous>, transform_indices = @transform_1, window_bounds = array<i64: 32, 96>}, {pipeline_mode = #tpu.pipeline_mode<synchronous>, transform_indices = @transform_2, window_bounds = array<i64: 1, 96>}, {pipeline_mode = #tpu.pipeline_mode<synchronous>, transform_indices = @transform_3, window_bounds = array<i64: 32, 32>}, {pipeline_mode = #tpu.pipeline_mode<synchronous>, transform_indices = @transform_4, window_bounds = array<i64: 1, 32>}, {transform_indices = @transform_5, window_bounds = array<i64: 1, 8, 32>}, {transform_indices = @transform_6, window_bounds = array<i64: 2, 1, 8, 32>}]} {
    %c0_i32 = arith.constant 0 : i32
    %0 = arith.cmpi eq, %arg1, %c0_i32 : i32
    %1 = arith.extui %0 : i1 to i32
    %c0_i32_0 = arith.constant 0 : i32
    %2 = arith.cmpi ne, %1, %c0_i32_0 : i32
    scf.if %2 {
      %c0_14 = arith.constant 0 : index
      %c0_15 = arith.constant 0 : index
      %c0_16 = arith.constant 0 : index
      %35 = vector.load %arg2[%c0_14, %c0_15, %c0_16] : memref<1x8x32xf32, #tpu.memory_space<vmem>>, vector<1x8x32xf32>
      %36 = vector.shape_cast %35 : vector<1x8x32xf32> to vector<8x32xf32>
      %c0_17 = arith.constant 0 : index
      %c0_18 = arith.constant 0 : index
      %37 = vector.load %arg3[%c0_17, %c0_18] : memref<32x96xf32, #tpu.memory_space<vmem>>, vector<32x96xf32>
      %cst_19 = arith.constant dense<0.000000e+00> : vector<8x96xf32>
      %38 = tpu.matmul %36, %37, %cst_19 {dimension_numbers = #tpu.dot_dimension_numbers<[1], [0], [0], [1], [0, 0, 1, 1], [], []>} : vector<8x32xf32>, vector<32x96xf32>, vector<8x96xf32> -> vector<8x96xf32>
      %c0_20 = arith.constant 0 : index
      %c0_21 = arith.constant 0 : index
      %39 = vector.load %arg4[%c0_20, %c0_21] : memref<1x96xf32, #tpu.memory_space<vmem>>, vector<1x96xf32>
      %40 = vector.broadcast %39 : vector<1x96xf32> to vector<8x96xf32>
      %41 = arith.addf %38, %40 : vector<8x96xf32>
      %42 = vector.extract_strided_slice %41 {offsets = [0, 64], sizes = [8, 32], strides = [1, 1]} : vector<8x96xf32> to vector<8x32xf32>
      %c0_22 = arith.constant 0 : index
      %c0_23 = arith.constant 0 : index
      %c0_24 = arith.constant 0 : index
      %c0_25 = arith.constant 0 : index
      %43 = vector.load %arg8[%c0_22, %c0_23, %c0_24, %c0_25] : memref<2x1x8x32xf32, #tpu.memory_space<vmem>>, vector<1x1x8x32xf32>
      %44 = vector.shape_cast %43 : vector<1x1x8x32xf32> to vector<8x32xf32>
      %45 = vector.shape_cast %42 : vector<8x32xf32> to vector<1x1x8x32xf32>
      tpu.vector_store %arg8[%c0_22, %c0_23, %c0_24, %c0_25], %45 {strides = array<i32>} : memref<2x1x8x32xf32, #tpu.memory_space<vmem>>, vector<1x1x8x32xf32>,
      %46 = vector.extract_strided_slice %41 {offsets = [0, 0], sizes = [8, 32], strides = [1, 1]} : vector<8x96xf32> to vector<8x32xf32>
      %c1_26 = arith.constant 1 : index
      %c0_27 = arith.constant 0 : index
      %c0_28 = arith.constant 0 : index
      %c0_29 = arith.constant 0 : index
      %47 = vector.load %arg8[%c1_26, %c0_27, %c0_28, %c0_29] : memref<2x1x8x32xf32, #tpu.memory_space<vmem>>, vector<1x1x8x32xf32>
      %48 = vector.shape_cast %47 : vector<1x1x8x32xf32> to vector<8x32xf32>
      %49 = vector.shape_cast %46 : vector<8x32xf32> to vector<1x1x8x32xf32>
      tpu.vector_store %arg8[%c1_26, %c0_27, %c0_28, %c0_29], %49 {strides = array<i32>} : memref<2x1x8x32xf32, #tpu.memory_space<vmem>>, vector<1x1x8x32xf32>,
      %50 = vector.extract_strided_slice %41 {offsets = [0, 0], sizes = [8, 8], strides = [1, 1]} : vector<8x96xf32> to vector<8x8xf32>
      %c0_30 = arith.constant 0 : index
      %c0_31 = arith.constant 0 : index
      %c0_32 = arith.constant 0 : index
      %c0_33 = arith.constant 0 : index
      %51 = vector.load %arg9[%c0_30, %c0_31, %c0_32, %c0_33] : memref<3x4x8x8xf32, #tpu.memory_space<vmem>>, vector<1x1x8x8xf32>
      %52 = vector.shape_cast %51 : vector<1x1x8x8xf32> to vector<8x8xf32>
      %53 = vector.shape_cast %50 : vector<8x8xf32> to vector<1x1x8x8xf32>
      tpu.vector_store %arg9[%c0_30, %c0_31, %c0_32, %c0_33], %53 {strides = array<i32>} : memref<3x4x8x8xf32, #tpu.memory_space<vmem>>, vector<1x1x8x8xf32>,
      %54 = vector.extract_strided_slice %41 {offsets = [0, 32], sizes = [8, 8], strides = [1, 1]} : vector<8x96xf32> to vector<8x8xf32>
      %cst_34 = arith.constant 0.353553385 : f32
      %55 = vector.broadcast %cst_34 : f32 to vector<8x8xf32>
      %56 = arith.mulf %54, %55 : vector<8x8xf32>
      %c1_35 = arith.constant 1 : index
      %c0_36 = arith.constant 0 : index
      %c0_37 = arith.constant 0 : index
      %c0_38 = arith.constant 0 : index
      %57 = vector.load %arg9[%c1_35, %c0_36, %c0_37, %c0_38] : memref<3x4x8x8xf32, #tpu.memory_space<vmem>>, vector<1x1x8x8xf32>
      %58 = vector.shape_cast %57 : vector<1x1x8x8xf32> to vector<8x8xf32>
      %59 = vector.shape_cast %56 : vector<8x8xf32> to vector<1x1x8x8xf32>
      tpu.vector_store %arg9[%c1_35, %c0_36, %c0_37, %c0_38], %59 {strides = array<i32>} : memref<3x4x8x8xf32, #tpu.memory_space<vmem>>, vector<1x1x8x8xf32>,
      %60 = vector.extract_strided_slice %41 {offsets = [0, 64], sizes = [8, 8], strides = [1, 1]} : vector<8x96xf32> to vector<8x8xf32>
      %c2_39 = arith.constant 2 : index
      %c0_40 = arith.constant 0 : index
      %c0_41 = arith.constant 0 : index
      %c0_42 = arith.constant 0 : index
      %61 = vector.load %arg9[%c2_39, %c0_40, %c0_41, %c0_42] : memref<3x4x8x8xf32, #tpu.memory_space<vmem>>, vector<1x1x8x8xf32>
      %62 = vector.shape_cast %61 : vector<1x1x8x8xf32> to vector<8x8xf32>
      %63 = vector.shape_cast %60 : vector<8x8xf32> to vector<1x1x8x8xf32>
      tpu.vector_store %arg9[%c2_39, %c0_40, %c0_41, %c0_42], %63 {strides = array<i32>} : memref<3x4x8x8xf32, #tpu.memory_space<vmem>>, vector<1x1x8x8xf32>,
      %64 = vector.extract_strided_slice %41 {offsets = [0, 8], sizes = [8, 8], strides = [1, 1]} : vector<8x96xf32> to vector<8x8xf32>
      %c0_43 = arith.constant 0 : index
      %c1_44 = arith.constant 1 : index
      %c0_45 = arith.constant 0 : index
      %c0_46 = arith.constant 0 : index
      %65 = vector.load %arg9[%c0_43, %c1_44, %c0_45, %c0_46] : memref<3x4x8x8xf32, #tpu.memory_space<vmem>>, vector<1x1x8x8xf32>
      %66 = vector.shape_cast %65 : vector<1x1x8x8xf32> to vector<8x8xf32>
      %67 = vector.shape_cast %64 : vector<8x8xf32> to vector<1x1x8x8xf32>
      tpu.vector_store %arg9[%c0_43, %c1_44, %c0_45, %c0_46], %67 {strides = array<i32>} : memref<3x4x8x8xf32, #tpu.memory_space<vmem>>, vector<1x1x8x8xf32>,
      %68 = vector.extract_strided_slice %41 {offsets = [0, 40], sizes = [8, 8], strides = [1, 1]} : vector<8x96xf32> to vector<8x8xf32>
      %cst_47 = arith.constant 0.353553385 : f32
      %69 = vector.broadcast %cst_47 : f32 to vector<8x8xf32>
      %70 = arith.mulf %68, %69 : vector<8x8xf32>
      %c1_48 = arith.constant 1 : index
      %c1_49 = arith.constant 1 : index
      %c0_50 = arith.constant 0 : index
      %c0_51 = arith.constant 0 : index
      %71 = vector.load %arg9[%c1_48, %c1_49, %c0_50, %c0_51] : memref<3x4x8x8xf32, #tpu.memory_space<vmem>>, vector<1x1x8x8xf32>
      %72 = vector.shape_cast %71 : vector<1x1x8x8xf32> to vector<8x8xf32>
      %73 = vector.shape_cast %70 : vector<8x8xf32> to vector<1x1x8x8xf32>
      tpu.vector_store %arg9[%c1_48, %c1_49, %c0_50, %c0_51], %73 {strides = array<i32>} : memref<3x4x8x8xf32, #tpu.memory_space<vmem>>, vector<1x1x8x8xf32>,
      %74 = vector.extract_strided_slice %41 {offsets = [0, 72], sizes = [8, 8], strides = [1, 1]} : vector<8x96xf32> to vector<8x8xf32>
      %c2_52 = arith.constant 2 : index
      %c1_53 = arith.constant 1 : index
      %c0_54 = arith.constant 0 : index
      %c0_55 = arith.constant 0 : index
      %75 = vector.load %arg9[%c2_52, %c1_53, %c0_54, %c0_55] : memref<3x4x8x8xf32, #tpu.memory_space<vmem>>, vector<1x1x8x8xf32>
      %76 = vector.shape_cast %75 : vector<1x1x8x8xf32> to vector<8x8xf32>
      %77 = vector.shape_cast %74 : vector<8x8xf32> to vector<1x1x8x8xf32>
      tpu.vector_store %arg9[%c2_52, %c1_53, %c0_54, %c0_55], %77 {strides = array<i32>} : memref<3x4x8x8xf32, #tpu.memory_space<vmem>>, vector<1x1x8x8xf32>,
      %78 = vector.extract_strided_slice %41 {offsets = [0, 16], sizes = [8, 8], strides = [1, 1]} : vector<8x96xf32> to vector<8x8xf32>
      %c0_56 = arith.constant 0 : index
      %c2_57 = arith.constant 2 : index
      %c0_58 = arith.constant 0 : index
      %c0_59 = arith.constant 0 : index
      %79 = vector.load %arg9[%c0_56, %c2_57, %c0_58, %c0_59] : memref<3x4x8x8xf32, #tpu.memory_space<vmem>>, vector<1x1x8x8xf32>
      %80 = vector.shape_cast %79 : vector<1x1x8x8xf32> to vector<8x8xf32>
      %81 = vector.shape_cast %78 : vector<8x8xf32> to vector<1x1x8x8xf32>
      tpu.vector_store %arg9[%c0_56, %c2_57, %c0_58, %c0_59], %81 {strides = array<i32>} : memref<3x4x8x8xf32, #tpu.memory_space<vmem>>, vector<1x1x8x8xf32>,
      %82 = vector.extract_strided_slice %41 {offsets = [0, 48], sizes = [8, 8], strides = [1, 1]} : vector<8x96xf32> to vector<8x8xf32>
      %cst_60 = arith.constant 0.353553385 : f32
      %83 = vector.broadcast %cst_60 : f32 to vector<8x8xf32>
      %84 = arith.mulf %82, %83 : vector<8x8xf32>
      %c1_61 = arith.constant 1 : index
      %c2_62 = arith.constant 2 : index
      %c0_63 = arith.constant 0 : index
      %c0_64 = arith.constant 0 : index
      %85 = vector.load %arg9[%c1_61, %c2_62, %c0_63, %c0_64] : memref<3x4x8x8xf32, #tpu.memory_space<vmem>>, vector<1x1x8x8xf32>
      %86 = vector.shape_cast %85 : vector<1x1x8x8xf32> to vector<8x8xf32>
      %87 = vector.shape_cast %84 : vector<8x8xf32> to vector<1x1x8x8xf32>
      tpu.vector_store %arg9[%c1_61, %c2_62, %c0_63, %c0_64], %87 {strides = array<i32>} : memref<3x4x8x8xf32, #tpu.memory_space<vmem>>, vector<1x1x8x8xf32>,
      %88 = vector.extract_strided_slice %41 {offsets = [0, 80], sizes = [8, 8], strides = [1, 1]} : vector<8x96xf32> to vector<8x8xf32>
      %c2_65 = arith.constant 2 : index
      %c2_66 = arith.constant 2 : index
      %c0_67 = arith.constant 0 : index
      %c0_68 = arith.constant 0 : index
      %89 = vector.load %arg9[%c2_65, %c2_66, %c0_67, %c0_68] : memref<3x4x8x8xf32, #tpu.memory_space<vmem>>, vector<1x1x8x8xf32>
      %90 = vector.shape_cast %89 : vector<1x1x8x8xf32> to vector<8x8xf32>
      %91 = vector.shape_cast %88 : vector<8x8xf32> to vector<1x1x8x8xf32>
      tpu.vector_store %arg9[%c2_65, %c2_66, %c0_67, %c0_68], %91 {strides = array<i32>} : memref<3x4x8x8xf32, #tpu.memory_space<vmem>>, vector<1x1x8x8xf32>,
      %92 = vector.extract_strided_slice %41 {offsets = [0, 24], sizes = [8, 8], strides = [1, 1]} : vector<8x96xf32> to vector<8x8xf32>
      %c0_69 = arith.constant 0 : index
      %c3 = arith.constant 3 : index
      %c0_70 = arith.constant 0 : index
      %c0_71 = arith.constant 0 : index
      %93 = vector.load %arg9[%c0_69, %c3, %c0_70, %c0_71] : memref<3x4x8x8xf32, #tpu.memory_space<vmem>>, vector<1x1x8x8xf32>
      %94 = vector.shape_cast %93 : vector<1x1x8x8xf32> to vector<8x8xf32>
      %95 = vector.shape_cast %92 : vector<8x8xf32> to vector<1x1x8x8xf32>
      tpu.vector_store %arg9[%c0_69, %c3, %c0_70, %c0_71], %95 {strides = array<i32>} : memref<3x4x8x8xf32, #tpu.memory_space<vmem>>, vector<1x1x8x8xf32>,
      %96 = vector.extract_strided_slice %41 {offsets = [0, 56], sizes = [8, 8], strides = [1, 1]} : vector<8x96xf32> to vector<8x8xf32>
      %cst_72 = arith.constant 0.353553385 : f32
      %97 = vector.broadcast %cst_72 : f32 to vector<8x8xf32>
      %98 = arith.mulf %96, %97 : vector<8x8xf32>
      %c1_73 = arith.constant 1 : index
      %c3_74 = arith.constant 3 : index
      %c0_75 = arith.constant 0 : index
      %c0_76 = arith.constant 0 : index
      %99 = vector.load %arg9[%c1_73, %c3_74, %c0_75, %c0_76] : memref<3x4x8x8xf32, #tpu.memory_space<vmem>>, vector<1x1x8x8xf32>
      %100 = vector.shape_cast %99 : vector<1x1x8x8xf32> to vector<8x8xf32>
      %101 = vector.shape_cast %98 : vector<8x8xf32> to vector<1x1x8x8xf32>
      tpu.vector_store %arg9[%c1_73, %c3_74, %c0_75, %c0_76], %101 {strides = array<i32>} : memref<3x4x8x8xf32, #tpu.memory_space<vmem>>, vector<1x1x8x8xf32>,
      %102 = vector.extract_strided_slice %41 {offsets = [0, 88], sizes = [8, 8], strides = [1, 1]} : vector<8x96xf32> to vector<8x8xf32>
      %c2_77 = arith.constant 2 : index
      %c3_78 = arith.constant 3 : index
      %c0_79 = arith.constant 0 : index
      %c0_80 = arith.constant 0 : index
      %103 = vector.load %arg9[%c2_77, %c3_78, %c0_79, %c0_80] : memref<3x4x8x8xf32, #tpu.memory_space<vmem>>, vector<1x1x8x8xf32>
      %104 = vector.shape_cast %103 : vector<1x1x8x8xf32> to vector<8x8xf32>
      %105 = vector.shape_cast %102 : vector<8x8xf32> to vector<1x1x8x8xf32>
      tpu.vector_store %arg9[%c2_77, %c3_78, %c0_79, %c0_80], %105 {strides = array<i32>} : memref<3x4x8x8xf32, #tpu.memory_space<vmem>>, vector<1x1x8x8xf32>,
    } else {
    }
    %c0 = arith.constant 0 : index
    %3 = arith.index_cast %arg1 : i32 to index
    %c0_1 = arith.constant 0 : index
    %c0_2 = arith.constant 0 : index
    %4 = vector.load %arg9[%c0, %3, %c0_1, %c0_2] : memref<3x4x8x8xf32, #tpu.memory_space<vmem>>, vector<1x1x8x8xf32>
    %5 = vector.shape_cast %4 : vector<1x1x8x8xf32> to vector<8x8xf32>
    %c1 = arith.constant 1 : index
    %6 = arith.index_cast %arg1 : i32 to index
    %c0_3 = arith.constant 0 : index
    %c0_4 = arith.constant 0 : index
    %7 = vector.load %arg9[%c1, %6, %c0_3, %c0_4] : memref<3x4x8x8xf32, #tpu.memory_space<vmem>>, vector<1x1x8x8xf32>
    %8 = vector.shape_cast %7 : vector<1x1x8x8xf32> to vector<8x8xf32>
    %c2 = arith.constant 2 : index
    %9 = arith.index_cast %arg1 : i32 to index
    %c0_5 = arith.constant 0 : index
    %c0_6 = arith.constant 0 : index
    %10 = vector.load %arg9[%c2, %9, %c0_5, %c0_6] : memref<3x4x8x8xf32, #tpu.memory_space<vmem>>, vector<1x1x8x8xf32>
    %11 = vector.shape_cast %10 : vector<1x1x8x8xf32> to vector<8x8xf32>
    %cst = arith.constant dense<0.000000e+00> : vector<8x8xf32>
    %12 = tpu.matmul %8, %11, %cst {dimension_numbers = #tpu.dot_dimension_numbers<[1], [1], [0], [0], [0, 0, 1, 0], [], []>} : vector<8x8xf32>, vector<8x8xf32>, vector<8x8xf32> -> vector<8x8xf32>
    %13 = tpu.iota {dimensions = array<i32: 0>} : vector<8x8xi32>
    %14 = tpu.iota {dimensions = array<i32: 1>} : vector<8x8xi32>
    %15 = arith.cmpi sle, %14, %13 : vector<8x8xi32>
    %cst_7 = arith.constant -1.000000e+10 : f32
    %16 = vector.broadcast %cst_7 : f32 to vector<8x8xf32>
    %17 = arith.select %15, %12, %16 : vector<8x8xi1>, vector<8x8xf32>
    %cst_8 = arith.constant dense<0xFF800000> : vector<8xf32>
    %18 = vector.multi_reduction <maximumf>, %17, %cst_8 [1] : vector<8x8xf32> to vector<8xf32>
    %19 = vector.shape_cast %18 : vector<8xf32> to vector<8x1xf32>
    %20 = vector.broadcast %19 : vector<8x1xf32> to vector<8x8xf32>
    %21 = arith.subf %17, %20 : vector<8x8xf32>
    %22 = math.exp %21 : vector<8x8xf32>
    %cst_9 = arith.constant dense<0.000000e+00> : vector<8xf32>
    %23 = vector.multi_reduction <add>, %22, %cst_9 [1] : vector<8x8xf32> to vector<8xf32>
    %24 = vector.shape_cast %23 : vector<8xf32> to vector<8x1xf32>
    %25 = vector.broadcast %24 : vector<8x1xf32> to vector<8x8xf32>
    %26 = arith.divf %22, %25 : vector<8x8xf32>
    %cst_10 = arith.constant dense<0.000000e+00> : vector<8x8xf32>
    %27 = tpu.matmul %26, %5, %cst_10 {dimension_numbers = #tpu.dot_dimension_numbers<[1], [0], [0], [1], [0, 0, 1, 1], [], []>} : vector<8x8xf32>, vector<8x8xf32>, vector<8x8xf32> -> vector<8x8xf32>
    %28 = arith.index_cast %arg1 : i32 to index
    %c0_11 = arith.constant 0 : index
    %c0_12 = arith.constant 0 : index
    %29 = vector.load %arg10[%28, %c0_11, %c0_12] : memref<4x8x8xf32, #tpu.memory_space<vmem>>, vector<1x8x8xf32>
    %30 = vector.shape_cast %29 : vector<1x8x8xf32> to vector<8x8xf32>
    %31 = vector.shape_cast %27 : vector<8x8xf32> to vector<1x8x8xf32>
    tpu.vector_store %arg10[%28, %c0_11, %c0_12], %31 {strides = array<i32>} : memref<4x8x8xf32, #tpu.memory_space<vmem>>, vector<1x8x8xf32>,
    %c3_i32 = arith.constant 3 : i32
    %32 = arith.cmpi eq, %arg1, %c3_i32 : i32
    %33 = arith.extui %32 : i1 to i32
    %c0_i32_13 = arith.constant 0 : i32
    %34 = arith.cmpi ne, %33, %c0_i32_13 : i32
    scf.if %34 {
      %c0_14 = arith.constant 0 : index
      %c0_15 = arith.constant 0 : index
      %c0_16 = arith.constant 0 : index
      %35 = vector.load %arg10[%c0_14, %c0_15, %c0_16] : memref<4x8x8xf32, #tpu.memory_space<vmem>>, vector<1x8x8xf32>
      %36 = vector.shape_cast %35 : vector<1x8x8xf32> to vector<8x8xf32>
      %c1_17 = arith.constant 1 : index
      %c0_18 = arith.constant 0 : index
      %c0_19 = arith.constant 0 : index
      %37 = vector.load %arg10[%c1_17, %c0_18, %c0_19] : memref<4x8x8xf32, #tpu.memory_space<vmem>>, vector<1x8x8xf32>
      %38 = vector.shape_cast %37 : vector<1x8x8xf32> to vector<8x8xf32>
      %c2_20 = arith.constant 2 : index
      %c0_21 = arith.constant 0 : index
      %c0_22 = arith.constant 0 : index
      %39 = vector.load %arg10[%c2_20, %c0_21, %c0_22] : memref<4x8x8xf32, #tpu.memory_space<vmem>>, vector<1x8x8xf32>
      %40 = vector.shape_cast %39 : vector<1x8x8xf32> to vector<8x8xf32>
      %41 = tpu.concatenate %36, %38, %40, %27 in 1 : vector<8x8xf32>, vector<8x8xf32>, vector<8x8xf32>, vector<8x8xf32> -> vector<8x32xf32>
      %c0_23 = arith.constant 0 : index
      %c0_24 = arith.constant 0 : index
      %42 = vector.load %arg5[%c0_23, %c0_24] : memref<32x32xf32, #tpu.memory_space<vmem>>, vector<32x32xf32>
      %cst_25 = arith.constant dense<0.000000e+00> : vector<8x32xf32>
      %43 = tpu.matmul %41, %42, %cst_25 {dimension_numbers = #tpu.dot_dimension_numbers<[1], [0], [0], [1], [0, 0, 1, 1], [], []>} : vector<8x32xf32>, vector<32x32xf32>, vector<8x32xf32> -> vector<8x32xf32>
      %c0_26 = arith.constant 0 : index
      %c0_27 = arith.constant 0 : index
      %44 = vector.load %arg6[%c0_26, %c0_27] : memref<1x32xf32, #tpu.memory_space<vmem>>, vector<1x32xf32>
      %45 = vector.broadcast %44 : vector<1x32xf32> to vector<8x32xf32>
      %46 = arith.addf %43, %45 : vector<8x32xf32>
      %c0_28 = arith.constant 0 : index
      %c0_29 = arith.constant 0 : index
      %c0_30 = arith.constant 0 : index
      %47 = vector.load %arg7[%c0_28, %c0_29, %c0_30] : memref<1x8x32xf32, #tpu.memory_space<vmem>>, vector<1x8x32xf32>
      %48 = vector.shape_cast %47 : vector<1x8x32xf32> to vector<8x32xf32>
      %49 = vector.shape_cast %46 : vector<8x32xf32> to vector<1x8x32xf32>
      tpu.vector_store %arg7[%c0_28, %c0_29, %c0_30], %49 {strides = array<i32>} : memref<1x8x32xf32, #tpu.memory_space<vmem>>, vector<1x8x32xf32>,
    } else {
    }
    return
  }
  func.func @transform_0(%arg0: i32, %arg1: i32) -> (i32, i32, i32) {
    %c0_i32 = arith.constant 0 : i32
    %c0_i32_0 = arith.constant 0 : i32
    %c0_i32_1 = arith.constant 0 : i32
    return %arg0, %c0_i32, %c0_i32_0 : i32, i32, i32
  }
  func.func @transform_1(%arg0: i32, %arg1: i32) -> (i32, i32) {
    %c0_i32 = arith.constant 0 : i32
    %c0_i32_0 = arith.constant 0 : i32
    %c0_i32_1 = arith.constant 0 : i32
    return %c0_i32, %c0_i32_0 : i32, i32
  }
  func.func @transform_2(%arg0: i32, %arg1: i32) -> (i32, i32) {
    %c0_i32 = arith.constant 0 : i32
    %c0_i32_0 = arith.constant 0 : i32
    %c0_i32_1 = arith.constant 0 : i32
    return %c0_i32, %c0_i32_0 : i32, i32
  }
  func.func @transform_3(%arg0: i32, %arg1: i32) -> (i32, i32) {
    %c0_i32 = arith.constant 0 : i32
    %c0_i32_0 = arith.constant 0 : i32
    %c0_i32_1 = arith.constant 0 : i32
    return %c0_i32, %c0_i32_0 : i32, i32
  }
  func.func @transform_4(%arg0: i32, %arg1: i32) -> (i32, i32) {
    %c0_i32 = arith.constant 0 : i32
    %c0_i32_0 = arith.constant 0 : i32
    %c0_i32_1 = arith.constant 0 : i32
    return %c0_i32, %c0_i32_0 : i32, i32
  }
  func.func @transform_5(%arg0: i32, %arg1: i32) -> (i32, i32, i32) {
    %c0_i32 = arith.constant 0 : i32
    %c0_i32_0 = arith.constant 0 : i32
    %c0_i32_1 = arith.constant 0 : i32
    return %arg0, %c0_i32, %c0_i32_0 : i32, i32, i32
  }
  func.func @transform_6(%arg0: i32, %arg1: i32) -> (i32, i32, i32, i32) {
    %c0_i32 = arith.constant 0 : i32
    %c0_i32_0 = arith.constant 0 : i32
    %c0_i32_1 = arith.constant 0 : i32
    %c0_i32_2 = arith.constant 0 : i32
    return %c0_i32, %arg0, %c0_i32_0, %c0_i32_1 : i32, i32, i32, i32
  }
}

module attributes {stable_mosaic.version = 11 : i64} {
  func.func @_fused_attn_kernel(%arg0: i32, %arg1: i32, %arg2: memref<1x8x32xf32, #tpu.memory_space<vmem>>, %arg3: memref<32x96xf32, #tpu.memory_space<vmem>>, %arg4: memref<1x96xf32, #tpu.memory_space<vmem>>, %arg5: memref<32x32xf32, #tpu.memory_space<vmem>>, %arg6: memref<1x32xf32, #tpu.memory_space<vmem>>, %arg7: memref<1x8x32xf32, #tpu.memory_space<vmem>>, %arg8: memref<2x1x8x32xf32, #tpu.memory_space<vmem>>, %arg9: memref<3x4x8x8xf32, #tpu.memory_space<vmem>>, %arg10: memref<4x8x8xf32, #tpu.memory_space<vmem>>) attributes {dimension_semantics = [#tpu.dimension_semantics<parallel>, #tpu.dimension_semantics<arbitrary>], iteration_bounds = array<i64: 2, 4>, scalar_prefetch = 0 : i64, scratch_operands = 2 : i64, tpu.core_type = #tpu.core_type<tc>, window_params = [{transform_indices = @transform_0, window_bounds = array<i64: 1, 8, 32>}, {pipeline_mode = #tpu.pipeline_mode<synchronous>, transform_indices = @transform_1, window_bounds = array<i64: 32, 96>}, {pipeline_mode = #tpu.pipeline_mode<synchronous>, transform_indices = @transform_2, window_bounds = array<i64: 1, 96>}, {pipeline_mode = #tpu.pipeline_mode<synchronous>, transform_indices = @transform_3, window_bounds = array<i64: 32, 32>}, {pipeline_mode = #tpu.pipeline_mode<synchronous>, transform_indices = @transform_4, window_bounds = array<i64: 1, 32>}, {transform_indices = @transform_5, window_bounds = array<i64: 1, 8, 32>}, {transform_indices = @transform_6, window_bounds = array<i64: 2, 1, 8, 32>}]} {
    %c0_i32 = arith.constant 0 : i32
    %0 = arith.cmpi eq, %arg1, %c0_i32 : i32
    %1 = arith.extui %0 : i1 to i32
    %c0_i32_0 = arith.constant 0 : i32
    %2 = arith.cmpi ne, %1, %c0_i32_0 : i32
    scf.if %2 {
      %c0_14 = arith.constant 0 : index
      %c0_15 = arith.constant 0 : index
      %c0_16 = arith.constant 0 : index
      %35 = vector.load %arg2[%c0_14, %c0_15, %c0_16] : memref<1x8x32xf32, #tpu.memory_space<vmem>>, vector<1x8x32xf32>
      %36 = vector.shape_cast %35 : vector<1x8x32xf32> to vector<8x32xf32>
      %c0_17 = arith.constant 0 : index
      %c0_18 = arith.constant 0 : index
      %37 = vector.load %arg3[%c0_17, %c0_18] : memref<32x96xf32, #tpu.memory_space<vmem>>, vector<32x96xf32>
      %cst_19 = arith.constant dense<0.000000e+00> : vector<8x96xf32>
      %38 = tpu.matmul %36, %37, %cst_19 {dimension_numbers = #tpu.dot_dimension_numbers<[1], [0], [0], [1], [0, 0, 1, 1], [], []>} : vector<8x32xf32>, vector<32x96xf32>, vector<8x96xf32> -> vector<8x96xf32>
      %c0_20 = arith.constant 0 : index
      %c0_21 = arith.constant 0 : index
      %39 = vector.load %arg4[%c0_20, %c0_21] : memref<1x96xf32, #tpu.memory_space<vmem>>, vector<1x96xf32>
      %40 = vector.broadcast %39 : vector<1x96xf32> to vector<8x96xf32>
      %41 = arith.addf %38, %40 : vector<8x96xf32>
      %42 = vector.extract_strided_slice %41 {offsets = [0, 64], sizes = [8, 32], strides = [1, 1]} : vector<8x96xf32> to vector<8x32xf32>
      %c0_22 = arith.constant 0 : index
      %c0_23 = arith.constant 0 : index
      %c0_24 = arith.constant 0 : index
      %c0_25 = arith.constant 0 : index
      %43 = vector.load %arg8[%c0_22, %c0_23, %c0_24, %c0_25] : memref<2x1x8x32xf32, #tpu.memory_space<vmem>>, vector<1x1x8x32xf32>
      %44 = vector.shape_cast %43 : vector<1x1x8x32xf32> to vector<8x32xf32>
      %45 = vector.shape_cast %42 : vector<8x32xf32> to vector<1x1x8x32xf32>
      tpu.vector_store %arg8[%c0_22, %c0_23, %c0_24, %c0_25], %45 {strides = array<i32>} : memref<2x1x8x32xf32, #tpu.memory_space<vmem>>, vector<1x1x8x32xf32>,
      %46 = vector.extract_strided_slice %41 {offsets = [0, 0], sizes = [8, 32], strides = [1, 1]} : vector<8x96xf32> to vector<8x32xf32>
      %c1_26 = arith.constant 1 : index
      %c0_27 = arith.constant 0 : index
      %c0_28 = arith.constant 0 : index
      %c0_29 = arith.constant 0 : index
      %47 = vector.load %arg8[%c1_26, %c0_27, %c0_28, %c0_29] : memref<2x1x8x32xf32, #tpu.memory_space<vmem>>, vector<1x1x8x32xf32>
      %48 = vector.shape_cast %47 : vector<1x1x8x32xf32> to vector<8x32xf32>
      %49 = vector.shape_cast %46 : vector<8x32xf32> to vector<1x1x8x32xf32>
      tpu.vector_store %arg8[%c1_26, %c0_27, %c0_28, %c0_29], %49 {strides = array<i32>} : memref<2x1x8x32xf32, #tpu.memory_space<vmem>>, vector<1x1x8x32xf32>,
      %50 = vector.extract_strided_slice %41 {offsets = [0, 0], sizes = [8, 8], strides = [1, 1]} : vector<8x96xf32> to vector<8x8xf32>
      %c0_30 = arith.constant 0 : index
      %c0_31 = arith.constant 0 : index
      %c0_32 = arith.constant 0 : index
      %c0_33 = arith.constant 0 : index
      %51 = vector.load %arg9[%c0_30, %c0_31, %c0_32, %c0_33] : memref<3x4x8x8xf32, #tpu.memory_space<vmem>>, vector<1x1x8x8xf32>
      %52 = vector.shape_cast %51 : vector<1x1x8x8xf32> to vector<8x8xf32>
      %53 = vector.shape_cast %50 : vector<8x8xf32> to vector<1x1x8x8xf32>
      tpu.vector_store %arg9[%c0_30, %c0_31, %c0_32, %c0_33], %53 {strides = array<i32>} : memref<3x4x8x8xf32, #tpu.memory_space<vmem>>, vector<1x1x8x8xf32>,
      %54 = vector.extract_strided_slice %41 {offsets = [0, 32], sizes = [8, 8], strides = [1, 1]} : vector<8x96xf32> to vector<8x8xf32>
      %cst_34 = arith.constant 0.353553385 : f32
      %55 = vector.broadcast %cst_34 : f32 to vector<8x8xf32>
      %56 = arith.mulf %54, %55 : vector<8x8xf32>
      %c1_35 = arith.constant 1 : index
      %c0_36 = arith.constant 0 : index
      %c0_37 = arith.constant 0 : index
      %c0_38 = arith.constant 0 : index
      %57 = vector.load %arg9[%c1_35, %c0_36, %c0_37, %c0_38] : memref<3x4x8x8xf32, #tpu.memory_space<vmem>>, vector<1x1x8x8xf32>
      %58 = vector.shape_cast %57 : vector<1x1x8x8xf32> to vector<8x8xf32>
      %59 = vector.shape_cast %56 : vector<8x8xf32> to vector<1x1x8x8xf32>
      tpu.vector_store %arg9[%c1_35, %c0_36, %c0_37, %c0_38], %59 {strides = array<i32>} : memref<3x4x8x8xf32, #tpu.memory_space<vmem>>, vector<1x1x8x8xf32>,
      %60 = vector.extract_strided_slice %41 {offsets = [0, 64], sizes = [8, 8], strides = [1, 1]} : vector<8x96xf32> to vector<8x8xf32>
      %c2_39 = arith.constant 2 : index
      %c0_40 = arith.constant 0 : index
      %c0_41 = arith.constant 0 : index
      %c0_42 = arith.constant 0 : index
      %61 = vector.load %arg9[%c2_39, %c0_40, %c0_41, %c0_42] : memref<3x4x8x8xf32, #tpu.memory_space<vmem>>, vector<1x1x8x8xf32>
      %62 = vector.shape_cast %61 : vector<1x1x8x8xf32> to vector<8x8xf32>
      %63 = vector.shape_cast %60 : vector<8x8xf32> to vector<1x1x8x8xf32>
      tpu.vector_store %arg9[%c2_39, %c0_40, %c0_41, %c0_42], %63 {strides = array<i32>} : memref<3x4x8x8xf32, #tpu.memory_space<vmem>>, vector<1x1x8x8xf32>,
      %64 = vector.extract_strided_slice %41 {offsets = [0, 8], sizes = [8, 8], strides = [1, 1]} : vector<8x96xf32> to vector<8x8xf32>
      %c0_43 = arith.constant 0 : index
      %c1_44 = arith.constant 1 : index
      %c0_45 = arith.constant 0 : index
      %c0_46 = arith.constant 0 : index
      %65 = vector.load %arg9[%c0_43, %c1_44, %c0_45, %c0_46] : memref<3x4x8x8xf32, #tpu.memory_space<vmem>>, vector<1x1x8x8xf32>
      %66 = vector.shape_cast %65 : vector<1x1x8x8xf32> to vector<8x8xf32>
      %67 = vector.shape_cast %64 : vector<8x8xf32> to vector<1x1x8x8xf32>
      tpu.vector_store %arg9[%c0_43, %c1_44, %c0_45, %c0_46], %67 {strides = array<i32>} : memref<3x4x8x8xf32, #tpu.memory_space<vmem>>, vector<1x1x8x8xf32>,
      %68 = vector.extract_strided_slice %41 {offsets = [0, 40], sizes = [8, 8], strides = [1, 1]} : vector<8x96xf32> to vector<8x8xf32>
      %cst_47 = arith.constant 0.353553385 : f32
      %69 = vector.broadcast %cst_47 : f32 to vector<8x8xf32>
      %70 = arith.mulf %68, %69 : vector<8x8xf32>
      %c1_48 = arith.constant 1 : index
      %c1_49 = arith.constant 1 : index
      %c0_50 = arith.constant 0 : index
      %c0_51 = arith.constant 0 : index
      %71 = vector.load %arg9[%c1_48, %c1_49, %c0_50, %c0_51] : memref<3x4x8x8xf32, #tpu.memory_space<vmem>>, vector<1x1x8x8xf32>
      %72 = vector.shape_cast %71 : vector<1x1x8x8xf32> to vector<8x8xf32>
      %73 = vector.shape_cast %70 : vector<8x8xf32> to vector<1x1x8x8xf32>
      tpu.vector_store %arg9[%c1_48, %c1_49, %c0_50, %c0_51], %73 {strides = array<i32>} : memref<3x4x8x8xf32, #tpu.memory_space<vmem>>, vector<1x1x8x8xf32>,
      %74 = vector.extract_strided_slice %41 {offsets = [0, 72], sizes = [8, 8], strides = [1, 1]} : vector<8x96xf32> to vector<8x8xf32>
      %c2_52 = arith.constant 2 : index
      %c1_53 = arith.constant 1 : index
      %c0_54 = arith.constant 0 : index
      %c0_55 = arith.constant 0 : index
      %75 = vector.load %arg9[%c2_52, %c1_53, %c0_54, %c0_55] : memref<3x4x8x8xf32, #tpu.memory_space<vmem>>, vector<1x1x8x8xf32>
      %76 = vector.shape_cast %75 : vector<1x1x8x8xf32> to vector<8x8xf32>
      %77 = vector.shape_cast %74 : vector<8x8xf32> to vector<1x1x8x8xf32>
      tpu.vector_store %arg9[%c2_52, %c1_53, %c0_54, %c0_55], %77 {strides = array<i32>} : memref<3x4x8x8xf32, #tpu.memory_space<vmem>>, vector<1x1x8x8xf32>,
      %78 = vector.extract_strided_slice %41 {offsets = [0, 16], sizes = [8, 8], strides = [1, 1]} : vector<8x96xf32> to vector<8x8xf32>
      %c0_56 = arith.constant 0 : index
      %c2_57 = arith.constant 2 : index
      %c0_58 = arith.constant 0 : index
      %c0_59 = arith.constant 0 : index
      %79 = vector.load %arg9[%c0_56, %c2_57, %c0_58, %c0_59] : memref<3x4x8x8xf32, #tpu.memory_space<vmem>>, vector<1x1x8x8xf32>
      %80 = vector.shape_cast %79 : vector<1x1x8x8xf32> to vector<8x8xf32>
      %81 = vector.shape_cast %78 : vector<8x8xf32> to vector<1x1x8x8xf32>
      tpu.vector_store %arg9[%c0_56, %c2_57, %c0_58, %c0_59], %81 {strides = array<i32>} : memref<3x4x8x8xf32, #tpu.memory_space<vmem>>, vector<1x1x8x8xf32>,
      %82 = vector.extract_strided_slice %41 {offsets = [0, 48], sizes = [8, 8], strides = [1, 1]} : vector<8x96xf32> to vector<8x8xf32>
      %cst_60 = arith.constant 0.353553385 : f32
      %83 = vector.broadcast %cst_60 : f32 to vector<8x8xf32>
      %84 = arith.mulf %82, %83 : vector<8x8xf32>
      %c1_61 = arith.constant 1 : index
      %c2_62 = arith.constant 2 : index
      %c0_63 = arith.constant 0 : index
      %c0_64 = arith.constant 0 : index
      %85 = vector.load %arg9[%c1_61, %c2_62, %c0_63, %c0_64] : memref<3x4x8x8xf32, #tpu.memory_space<vmem>>, vector<1x1x8x8xf32>
      %86 = vector.shape_cast %85 : vector<1x1x8x8xf32> to vector<8x8xf32>
      %87 = vector.shape_cast %84 : vector<8x8xf32> to vector<1x1x8x8xf32>
      tpu.vector_store %arg9[%c1_61, %c2_62, %c0_63, %c0_64], %87 {strides = array<i32>} : memref<3x4x8x8xf32, #tpu.memory_space<vmem>>, vector<1x1x8x8xf32>,
      %88 = vector.extract_strided_slice %41 {offsets = [0, 80], sizes = [8, 8], strides = [1, 1]} : vector<8x96xf32> to vector<8x8xf32>
      %c2_65 = arith.constant 2 : index
      %c2_66 = arith.constant 2 : index
      %c0_67 = arith.constant 0 : index
      %c0_68 = arith.constant 0 : index
      %89 = vector.load %arg9[%c2_65, %c2_66, %c0_67, %c0_68] : memref<3x4x8x8xf32, #tpu.memory_space<vmem>>, vector<1x1x8x8xf32>
      %90 = vector.shape_cast %89 : vector<1x1x8x8xf32> to vector<8x8xf32>
      %91 = vector.shape_cast %88 : vector<8x8xf32> to vector<1x1x8x8xf32>
      tpu.vector_store %arg9[%c2_65, %c2_66, %c0_67, %c0_68], %91 {strides = array<i32>} : memref<3x4x8x8xf32, #tpu.memory_space<vmem>>, vector<1x1x8x8xf32>,
      %92 = vector.extract_strided_slice %41 {offsets = [0, 24], sizes = [8, 8], strides = [1, 1]} : vector<8x96xf32> to vector<8x8xf32>
      %c0_69 = arith.constant 0 : index
      %c3 = arith.constant 3 : index
      %c0_70 = arith.constant 0 : index
      %c0_71 = arith.constant 0 : index
      %93 = vector.load %arg9[%c0_69, %c3, %c0_70, %c0_71] : memref<3x4x8x8xf32, #tpu.memory_space<vmem>>, vector<1x1x8x8xf32>
      %94 = vector.shape_cast %93 : vector<1x1x8x8xf32> to vector<8x8xf32>
      %95 = vector.shape_cast %92 : vector<8x8xf32> to vector<1x1x8x8xf32>
      tpu.vector_store %arg9[%c0_69, %c3, %c0_70, %c0_71], %95 {strides = array<i32>} : memref<3x4x8x8xf32, #tpu.memory_space<vmem>>, vector<1x1x8x8xf32>,
      %96 = vector.extract_strided_slice %41 {offsets = [0, 56], sizes = [8, 8], strides = [1, 1]} : vector<8x96xf32> to vector<8x8xf32>
      %cst_72 = arith.constant 0.353553385 : f32
      %97 = vector.broadcast %cst_72 : f32 to vector<8x8xf32>
      %98 = arith.mulf %96, %97 : vector<8x8xf32>
      %c1_73 = arith.constant 1 : index
      %c3_74 = arith.constant 3 : index
      %c0_75 = arith.constant 0 : index
      %c0_76 = arith.constant 0 : index
      %99 = vector.load %arg9[%c1_73, %c3_74, %c0_75, %c0_76] : memref<3x4x8x8xf32, #tpu.memory_space<vmem>>, vector<1x1x8x8xf32>
      %100 = vector.shape_cast %99 : vector<1x1x8x8xf32> to vector<8x8xf32>
      %101 = vector.shape_cast %98 : vector<8x8xf32> to vector<1x1x8x8xf32>
      tpu.vector_store %arg9[%c1_73, %c3_74, %c0_75, %c0_76], %101 {strides = array<i32>} : memref<3x4x8x8xf32, #tpu.memory_space<vmem>>, vector<1x1x8x8xf32>,
      %102 = vector.extract_strided_slice %41 {offsets = [0, 88], sizes = [8, 8], strides = [1, 1]} : vector<8x96xf32> to vector<8x8xf32>
      %c2_77 = arith.constant 2 : index
      %c3_78 = arith.constant 3 : index
      %c0_79 = arith.constant 0 : index
      %c0_80 = arith.constant 0 : index
      %103 = vector.load %arg9[%c2_77, %c3_78, %c0_79, %c0_80] : memref<3x4x8x8xf32, #tpu.memory_space<vmem>>, vector<1x1x8x8xf32>
      %104 = vector.shape_cast %103 : vector<1x1x8x8xf32> to vector<8x8xf32>
      %105 = vector.shape_cast %102 : vector<8x8xf32> to vector<1x1x8x8xf32>
      tpu.vector_store %arg9[%c2_77, %c3_78, %c0_79, %c0_80], %105 {strides = array<i32>} : memref<3x4x8x8xf32, #tpu.memory_space<vmem>>, vector<1x1x8x8xf32>,
    } else {
    }
    %c0 = arith.constant 0 : index
    %3 = arith.index_cast %arg1 : i32 to index
    %c0_1 = arith.constant 0 : index
    %c0_2 = arith.constant 0 : index
    %4 = vector.load %arg9[%c0, %3, %c0_1, %c0_2] : memref<3x4x8x8xf32, #tpu.memory_space<vmem>>, vector<1x1x8x8xf32>
    %5 = vector.shape_cast %4 : vector<1x1x8x8xf32> to vector<8x8xf32>
    %c1 = arith.constant 1 : index
    %6 = arith.index_cast %arg1 : i32 to index
    %c0_3 = arith.constant 0 : index
    %c0_4 = arith.constant 0 : index
    %7 = vector.load %arg9[%c1, %6, %c0_3, %c0_4] : memref<3x4x8x8xf32, #tpu.memory_space<vmem>>, vector<1x1x8x8xf32>
    %8 = vector.shape_cast %7 : vector<1x1x8x8xf32> to vector<8x8xf32>
    %c2 = arith.constant 2 : index
    %9 = arith.index_cast %arg1 : i32 to index
    %c0_5 = arith.constant 0 : index
    %c0_6 = arith.constant 0 : index
    %10 = vector.load %arg9[%c2, %9, %c0_5, %c0_6] : memref<3x4x8x8xf32, #tpu.memory_space<vmem>>, vector<1x1x8x8xf32>
    %11 = vector.shape_cast %10 : vector<1x1x8x8xf32> to vector<8x8xf32>
    %cst = arith.constant dense<0.000000e+00> : vector<8x8xf32>
    %12 = tpu.matmul %8, %11, %cst {dimension_numbers = #tpu.dot_dimension_numbers<[1], [1], [0], [0], [0, 0, 1, 0], [], []>} : vector<8x8xf32>, vector<8x8xf32>, vector<8x8xf32> -> vector<8x8xf32>
    %13 = tpu.iota {dimensions = array<i32: 0>} : vector<8x8xi32>
    %14 = tpu.iota {dimensions = array<i32: 1>} : vector<8x8xi32>
    %15 = arith.cmpi sle, %14, %13 : vector<8x8xi32>
    %cst_7 = arith.constant -1.000000e+10 : f32
    %16 = vector.broadcast %cst_7 : f32 to vector<8x8xf32>
    %17 = arith.select %15, %12, %16 : vector<8x8xi1>, vector<8x8xf32>
    %cst_8 = arith.constant dense<0xFF800000> : vector<8xf32>
    %18 = vector.multi_reduction <maximumf>, %17, %cst_8 [1] : vector<8x8xf32> to vector<8xf32>
    %19 = vector.shape_cast %18 : vector<8xf32> to vector<8x1xf32>
    %20 = vector.broadcast %19 : vector<8x1xf32> to vector<8x8xf32>
    %21 = arith.subf %17, %20 : vector<8x8xf32>
    %22 = math.exp %21 : vector<8x8xf32>
    %cst_9 = arith.constant dense<0.000000e+00> : vector<8xf32>
    %23 = vector.multi_reduction <add>, %22, %cst_9 [1] : vector<8x8xf32> to vector<8xf32>
    %24 = vector.shape_cast %23 : vector<8xf32> to vector<8x1xf32>
    %25 = vector.broadcast %24 : vector<8x1xf32> to vector<8x8xf32>
    %26 = arith.divf %22, %25 : vector<8x8xf32>
    %cst_10 = arith.constant dense<0.000000e+00> : vector<8x8xf32>
    %27 = tpu.matmul %26, %5, %cst_10 {dimension_numbers = #tpu.dot_dimension_numbers<[1], [0], [0], [1], [0, 0, 1, 1], [], []>} : vector<8x8xf32>, vector<8x8xf32>, vector<8x8xf32> -> vector<8x8xf32>
    %28 = arith.index_cast %arg1 : i32 to index
    %c0_11 = arith.constant 0 : index
    %c0_12 = arith.constant 0 : index
    %29 = vector.load %arg10[%28, %c0_11, %c0_12] : memref<4x8x8xf32, #tpu.memory_space<vmem>>, vector<1x8x8xf32>
    %30 = vector.shape_cast %29 : vector<1x8x8xf32> to vector<8x8xf32>
    %31 = vector.shape_cast %27 : vector<8x8xf32> to vector<1x8x8xf32>
    tpu.vector_store %arg10[%28, %c0_11, %c0_12], %31 {strides = array<i32>} : memref<4x8x8xf32, #tpu.memory_space<vmem>>, vector<1x8x8xf32>,
    %c3_i32 = arith.constant 3 : i32
    %32 = arith.cmpi eq, %arg1, %c3_i32 : i32
    %33 = arith.extui %32 : i1 to i32
    %c0_i32_13 = arith.constant 0 : i32
    %34 = arith.cmpi ne, %33, %c0_i32_13 : i32
    scf.if %34 {
      %c0_14 = arith.constant 0 : index
      %c0_15 = arith.constant 0 : index
      %c0_16 = arith.constant 0 : index
      %35 = vector.load %arg10[%c0_14, %c0_15, %c0_16] : memref<4x8x8xf32, #tpu.memory_space<vmem>>, vector<1x8x8xf32>
      %36 = vector.shape_cast %35 : vector<1x8x8xf32> to vector<8x8xf32>
      %c1_17 = arith.constant 1 : index
      %c0_18 = arith.constant 0 : index
      %c0_19 = arith.constant 0 : index
      %37 = vector.load %arg10[%c1_17, %c0_18, %c0_19] : memref<4x8x8xf32, #tpu.memory_space<vmem>>, vector<1x8x8xf32>
      %38 = vector.shape_cast %37 : vector<1x8x8xf32> to vector<8x8xf32>
      %c2_20 = arith.constant 2 : index
      %c0_21 = arith.constant 0 : index
      %c0_22 = arith.constant 0 : index
      %39 = vector.load %arg10[%c2_20, %c0_21, %c0_22] : memref<4x8x8xf32, #tpu.memory_space<vmem>>, vector<1x8x8xf32>
      %40 = vector.shape_cast %39 : vector<1x8x8xf32> to vector<8x8xf32>
      %41 = tpu.concatenate %36, %38, %40, %27 in 1 : vector<8x8xf32>, vector<8x8xf32>, vector<8x8xf32>, vector<8x8xf32> -> vector<8x32xf32>
      %c0_23 = arith.constant 0 : index
      %c0_24 = arith.constant 0 : index
      %42 = vector.load %arg5[%c0_23, %c0_24] : memref<32x32xf32, #tpu.memory_space<vmem>>, vector<32x32xf32>
      %cst_25 = arith.constant dense<0.000000e+00> : vector<8x32xf32>
      %43 = tpu.matmul %41, %42, %cst_25 {dimension_numbers = #tpu.dot_dimension_numbers<[1], [0], [0], [1], [0, 0, 1, 1], [], []>} : vector<8x32xf32>, vector<32x32xf32>, vector<8x32xf32> -> vector<8x32xf32>
      %c0_26 = arith.constant 0 : index
      %c0_27 = arith.constant 0 : index
      %44 = vector.load %arg6[%c0_26, %c0_27] : memref<1x32xf32, #tpu.memory_space<vmem>>, vector<1x32xf32>
      %45 = vector.broadcast %44 : vector<1x32xf32> to vector<8x32xf32>
      %46 = arith.addf %43, %45 : vector<8x32xf32>
      %c0_28 = arith.constant 0 : index
      %c0_29 = arith.constant 0 : index
      %c0_30 = arith.constant 0 : index
      %47 = vector.load %arg7[%c0_28, %c0_29, %c0_30] : memref<1x8x32xf32, #tpu.memory_space<vmem>>, vector<1x8x32xf32>
      %48 = vector.shape_cast %47 : vector<1x8x32xf32> to vector<8x32xf32>
      %49 = vector.shape_cast %46 : vector<8x32xf32> to vector<1x8x32xf32>
      tpu.vector_store %arg7[%c0_28, %c0_29, %c0_30], %49 {strides = array<i32>} : memref<1x8x32xf32, #tpu.memory_space<vmem>>, vector<1x8x32xf32>,
    } else {
    }
    return
  }
  func.func @transform_0(%arg0: i32, %arg1: i32) -> (i32, i32, i32) {
    %c0_i32 = arith.constant 0 : i32
    %c0_i32_0 = arith.constant 0 : i32
    %c0_i32_1 = arith.constant 0 : i32
    return %arg0, %c0_i32, %c0_i32_0 : i32, i32, i32
  }
  func.func @transform_1(%arg0: i32, %arg1: i32) -> (i32, i32) {
    %c0_i32 = arith.constant 0 : i32
    %c0_i32_0 = arith.constant 0 : i32
    %c0_i32_1 = arith.constant 0 : i32
    return %c0_i32, %c0_i32_0 : i32, i32
  }
  func.func @transform_2(%arg0: i32, %arg1: i32) -> (i32, i32) {
    %c0_i32 = arith.constant 0 : i32
    %c0_i32_0 = arith.constant 0 : i32
    %c0_i32_1 = arith.constant 0 : i32
    return %c0_i32, %c0_i32_0 : i32, i32
  }
  func.func @transform_3(%arg0: i32, %arg1: i32) -> (i32, i32) {
    %c0_i32 = arith.constant 0 : i32
    %c0_i32_0 = arith.constant 0 : i32
    %c0_i32_1 = arith.constant 0 : i32
    return %c0_i32, %c0_i32_0 : i32, i32
  }
  func.func @transform_4(%arg0: i32, %arg1: i32) -> (i32, i32) {
    %c0_i32 = arith.constant 0 : i32
    %c0_i32_0 = arith.constant 0 : i32
    %c0_i32_1 = arith.constant 0 : i32
    return %c0_i32, %c0_i32_0 : i32, i32
  }
  func.func @transform_5(%arg0: i32, %arg1: i32) -> (i32, i32, i32) {
    %c0_i32 = arith.constant 0 : i32
    %c0_i32_0 = arith.constant 0 : i32
    %c0_i32_1 = arith.constant 0 : i32
    return %arg0, %c0_i32, %c0_i32_0 : i32, i32, i32
  }
  func.func @transform_6(%arg0: i32, %arg1: i32) -> (i32, i32, i32, i32) {
    %c0_i32 = arith.constant 0 : i32
    %c0_i32_0 = arith.constant 0 : i32
    %c0_i32_1 = arith.constant 0 : i32
    %c0_i32_2 = arith.constant 0 : i32
    return %c0_i32, %arg0, %c0_i32_0, %c0_i32_1 : i32, i32, i32, i32
  }
}

</mosaic_0001>

<bundles_post_ra>
// kernel: tpu_custom_call.1
= control target key start
LH: loop header
LB: loop body
LE: loop exit
PB: predicated region body
PF: predicated region fallthrough
CT: control target
= control target key end

     0   :  { %s1796_s0 = inlined_call_operand.hbm [shape: f32[2,8,32], index: 0, kind: input, shape index: {}]   ;;  %s1797_s1 = inlined_call_operand.hbm [shape: f32[32,96], index: 1, kind: input, shape index: {}]   ;;  %s1798_s2 = inlined_call_operand.vmem [shape: f32[1,96], index: 2, kind: input, shape index: {}]   ;;  %s1799_s3 = inlined_call_operand.hbm [shape: f32[32,32], index: 3, kind: input, shape index: {}]   ;;  %s1800_s4 = inlined_call_operand.vmem [shape: f32[1,32], index: 4, kind: input, shape index: {}]   ;;  %s1801_s5 = inlined_call_operand.hbm [shape: f32[2,8,32], index: 5, kind: output, shape index: {0}]   ;;  %s1802_s6 = inlined_call_operand.hbm [shape: f32[2,2,8,32], index: 6, kind: output, shape index: {1}]  }
   0x1   :  { %1810 = sst [smem:[#allocation19_spill]] %s1797_s1 }
   0x2   :  { %1811 = sst [smem:[#allocation20_spill]] %s1802_s6 }
   0x3   :  { %12 = vsyncpa [#allocation5], 0 }
   0x4   :  { %14 = vsyncpa [#allocation5 + $0x1], 0 }
   0x5   :  { %15 = vsyncpa [#allocation8], 0 }
   0x6   :  { %16 = vsyncpa [#allocation6], 0 }
   0x7   :  { %18 = vsyncpa [#allocation6 + $0x1], 0 }
   0x8   :  { %19 = vsyncpa [#allocation12], 0 }
   0x9   :  { %21 = vsyncpa [#allocation12 + $0x1], 0  ;;  %s1455_s21 = smov 0   ;;  %s1457_s22 = smov 0  }
   0xa   :  { %s1459_s23 = smov 0   ;;  %s1461_s24 = smov 0  }
   0xb   :  { %s1463_s25 = smov 0   ;;  %s1465_s26 = smov 0  }
   0xc   :  { %s1467_s27 = smov 0   ;;  %s1469_s28 = smov 0  }
   0xd LB: > { %1812 = sst [smem:[#allocation17_spill]] %s1358_s21  ;;  %s938_s29 = sadd.s32 4294967295, %s1386_s28   ;;  %s1386_s28 = sphi %s1469_s28, %s27_s28   ;;  %s1382_s27 = sphi %s1467_s27, %s1838_s27   ;;  %s1378_s26 = sphi %s1465_s26, %s1837_s26   ;;  %s1374_s25 = sphi %s1463_s25, %s1836_s25   ;;  %s1370_s24 = sphi %s1461_s24, %s1835_s24   ;;  %s1366_s23 = sphi %s1459_s23, %s1834_s23   ;;  %s1362_s22 = sphi %s1457_s22, %s1833_s22   ;;  %s1358_s21 = sphi %s1455_s21, %s1832_s21  }
   0xe   : > { %s939_s30 = sadd.s32 4294967294, %s1386_s28   ;;  %p59_p0 = scmp.ne.s32.totalorder %s1362_s22, %s1358_s21 }
   0xf   : > { %p1499_p1 = scmp.eq.s32.totalorder %s938_s29, 0  ;;  %p1503_p2 = scmp.eq.s32.totalorder %s938_s29, 7 }
  0x10   : > { %p173_p3 = scmp.eq.s32.totalorder %s939_s30, 7  ;;  %p940_p5 = scmp.ge.s32.totalorder %s1386_s28, 1 }
  0x11   : > { %s1813_s7 = scalar_select %p1499_p1, 1, 0 }
  0x12   : > { %s1814_s8 = scalar_select %p1503_p2, 1, 0 }
  0x13   : > { %p1509_p4 = por %p1499_p1, %p59_p0  ;;  %p1514_p6 = por %p173_p3, %p59_p0 }
  0x14   : > { %p206_p7 = scmp.lt.s32.totalorder %s1386_s28, 9  ;;  %s1388_s12 = smov [#allocation7]  }
  0x15   : > { %s1815_s9 = scalar_select %p1509_p4, 1, 0 }
  0x16   : > { %s1816_s10 = scalar_select %p1514_p6, 1, 0 }
  0x17   : > { %p1519_p8 = pnand %p940_p5, %p206_p7  ;;  %s218_s13 = sshll.u32 %s1388_s12, 4  ;;  %s219_s13 = int_to_ptr.vmem [resolvable:$true] %s218_s13 }
  0x18   : > { %1817 = sst [smem:[#allocation18_spill]] %s1816_s10  ;;  %s1389_s15 = smov [#allocation9]  }
  0x19   : > { %s1818_s11 = scalar_select %p1519_p8, 1, 0 }
  0x1a   : > { %p1045_p9 = pneg %p1519_p8  ;;  %s234_s16 = sshll.u32 %s1389_s15, 4  ;;  %s1531_s16 = int_to_ptr.vmem [resolvable:$true] %s234_s16 }
  0x1b   : > { %s1820_s1 = sld [smem:[#allocation19_spill]] }
  0x1c   : > { %p1527_p10 = pnand %p1045_p9, %p1499_p1 }
  0x1e   : > { %p1168_p12 = pneg %p1527_p10 }
  0x21   : > { %s1166_s19 = scalar_lea.hbm %s1820_s1, 512 }
  0x22   : > { %p1167_p11 = scmp.ne.s32.totalorder %s1820_s1, %s1166_s19  ;;  %p1173_p3 = scmp.lt.u32.totalorder %s1166_s19, %s1820_s1 }
  0x24   : > { %p1169_p13 = pnand %p1168_p12, %p1167_p11 }
  0x26   : > { %p1170_p0 = pneg %p1169_p13 }
  0x28   : > { %p1175_p5 = pnand %p1173_p3, %p1170_p0 }
  0x2a   : > { %1178 = shalt.err (!%p1175_p5)
}
  0x2b   : > { %s1179_s15 = scalar_lea.vmem %s219_s13, 512  ;;  %p1187_p1 = scmp.lt.s32.totalorder %s219_s13, %s219_s13 }
  0x2c   : > { %p1180_p7 = scmp.ne.s32.totalorder %s219_s13, %s1179_s15  ;;  %p1188_p4 = scmp.lt.s32.totalorder %s1179_s15, %s1179_s15 }
  0x2e   : > { %p1182_p9 = pnand %p1180_p7, %p1168_p12  ;;  %p1189_p8 = por %p1188_p4, %p1187_p1 }
  0x30   : > { %p1183_p6 = pneg %p1182_p9 }
  0x32   : > { %p1190_p2 = pnand %p1189_p8, %p1183_p6 }
  0x34   : > { %1193 = shalt.err (!%p1190_p2)
}
  0x35   : > { %s1390_s17 = smov 128   ;;  %s1391_s18 = smov 8  }
  0x36   : > { %1048 = dma.hbm_to_vmem [thread:$0]  (!%p1527_p10), %s1820_s1, 512, %s219_s13, [#allocation8], %s1390_s17, %s1390_s17, %s1391_s18  }
  0x37   : > { %s1194_s12 = scalar_lea.hbm %s1799_s3, 512 }
  0x38   : > { %p1195_p11 = scmp.ne.s32.totalorder %s1799_s3, %s1194_s12  ;;  %p1201_p4 = scmp.lt.u32.totalorder %s1194_s12, %s1799_s3 }
  0x3a   : > { %p1197_p1 = pnand %p1195_p11, %p1168_p12 }
  0x3c   : > { %p1198_p2 = pneg %p1197_p1 }
  0x3e   : > { %p1203_p6 = pnand %p1201_p4, %p1198_p2 }
  0x40   : > { %1206 = shalt.err (!%p1203_p6)
}
  0x41   : > { %s1207_s13 = scalar_lea.vmem %s1531_s16, 512  ;;  %p1215_p3 = scmp.lt.s32.totalorder %s1531_s16, %s1531_s16 }
  0x42   : > { %p1208_p8 = scmp.ne.s32.totalorder %s1531_s16, %s1207_s13  ;;  %p1216_p5 = scmp.lt.s32.totalorder %s1207_s13, %s1207_s13 }
  0x44   : > { %p1210_p13 = pnand %p1208_p8, %p1168_p12  ;;  %p1217_p7 = por %p1216_p5, %p1215_p3 }
  0x46   : > { %p1211_p0 = pneg %p1210_p13 }
  0x48   : > { %p1218_p9 = pnand %p1217_p7, %p1211_p0 }
  0x4a   : > { %1221 = shalt.err (!%p1218_p9)
}
  0x4b   : > { %1051 = dma.hbm_to_vmem [thread:$0]  (!%p1527_p10), %s1799_s3, 512, %s1531_s16, [#allocation8], %s1390_s17, %s1390_s17, %s1391_s18  }
  0x4c   : > { %s36_s10 = sadd.s32 1, %s1378_s26  ;;  %s39_s19 = sadd.s32 1, %s1382_s27 }
  0x4d   : > { %p37_p12 = scmp.ge.s32.totalorder %s36_s10, 4  ;;  %s46_s14 = sadd.s32 1, %s1366_s23 }
  0x4e   : > { %p53_p11 = scmp.ne.s32.totalorder %s1366_s23, %s1362_s22  ;;  %p54_p1 = scmp.eq.s32.totalorder %s1386_s28, 0 }
  0x4f   : > { %s1840_s10 = smov (%p37_p12, %s36_s10), 0  ;;  %s1842_s19 = smov (!%p37_p12, %s39_s19), %s1382_s27 }
  0x50   : > { %p1589_p2 = por %p54_p1, %p53_p11  ;;  %p1822_p4 = scmp.ne.s32.totalorder %s1814_s8, 0 }
  0x51   : > { %p41_p10 = scmp.ge.s32.totalorder %s1842_s19, 2  ;;  %p1065_p8 = scmp.lt.s32.totalorder %s1386_s28, 8 }
  0x52   : > { %p1595_p6 = por %p1822_p4, %p53_p11  ;;  %s251_s16 = sand.u32 1, %s1366_s23  }
  0x53   : > { %s945_s17 = sshll.u32 %s1382_s27, 7  ;;  %s1844_s19 = smov (%p41_p10, %s1842_s19), 0 }
  0x54   : > { %s944_s18 = sshll.u32 %s251_s16, 3  ;;  %s43_s30 = ssub.s32 %s1382_s27, %s1844_s19 }
  0x55   : > { %p44_p13 = scmp.eq.s32.totalorder %s43_s30, 0  ;;  %s1609_s13 = scalar_lea.hbm %s1796_s0, %s945_s17 }
  0x56   : > { %s255_s8 = scalar_lea.vmem [#allocation4], %s944_s18  ;;  %p1613_p0 = pnand %p1065_p8, %p1589_p2 }
  0x57   : > { %s262_s6 = sshll.u32 %s255_s8, 4  ;;  %s252_s30 = scalar_lea.sflag [#allocation5], %s251_s16  ;;  %s1620_s6 = int_to_ptr.vmem [resolvable:$true] %s262_s6 }
  0x58   : > { %s1618_s1 = scalar_select %p44_p13, %s1366_s23, %s46_s14  }
  0x59   : > { %s1222_s17 = scalar_lea.hbm %s1609_s13, 128  ;;  %p1224_p5 = pneg %p1613_p0 }
  0x5a   : > { %p1223_p3 = scmp.ne.s32.totalorder %s1609_s13, %s1222_s17  ;;  %s1227_s12 = scalar_lea.hbm %s1796_s0, 256 }
  0x5b   : > { %p1228_p12 = scmp.lt.u32.totalorder %s1609_s13, %s1796_s0  ;;  %p1229_p11 = scmp.lt.u32.totalorder %s1227_s12, %s1222_s17 }
  0x5c   : > { %p1225_p7 = pnand %p1224_p5, %p1223_p3  ;;  %p1231_p2 = scmp.lt.u32.totalorder %s1222_s17, %s1609_s13 }
  0x5d   : > { %p1230_p1 = por %p1229_p11, %p1228_p12 }
  0x5e   : > { %p1226_p9 = pneg %p1225_p7 }
  0x5f   : > { %p1232_p4 = por %p1231_p2, %p1230_p1 }
  0x61   : > { %p1233_p10 = pnand %p1232_p4, %p1226_p9 }
  0x63   : > { %1236 = shalt.err (!%p1233_p10)
}
  0x64   : > { %s1237_s14 = scalar_lea.vmem %s1620_s6, 128  ;;  %s1392_s16 = smov [#allocation4]  }
  0x65   : > { %p1238_p8 = scmp.ne.s32.totalorder %s1620_s6, %s1237_s14  ;;  %s1242_s20 = sshll.u32 %s1392_s16, 4  ;;  %s1243_s20 = int_to_ptr.vmem [resolvable:$false] %s1242_s20 }
  0x66   : > { %s1244_s18 = scalar_lea.vmem %s1243_s20, 256  ;;  %p1245_p7 = scmp.lt.s32.totalorder %s1620_s6, %s1243_s20 }
  0x67   : > { %p1240_p13 = pnand %p1238_p8, %p1224_p5  ;;  %p1246_p12 = scmp.lt.s32.totalorder %s1244_s18, %s1237_s14 }
  0x69   : > { %p1241_p3 = pneg %p1240_p13  ;;  %p1247_p11 = por %p1246_p12, %p1245_p7 }
  0x6b   : > { %p1248_p1 = pnand %p1247_p11, %p1241_p3 }
  0x6d   : > { %1251 = shalt.err (!%p1248_p1)
}
  0x6e   : > { %1055 = dma.hbm_to_vmem [thread:$0]  (!%p1613_p0), %s1609_s13, 128, %s1620_s6, %s252_s30  }
  0x6f   : > { %p1825_p9 = scmp.ne.s32.totalorder %s1818_s11, 0 }
  0x70   : > { %s1650_s17 = sand.u32 (!%p1825_p9), 1, %s1362_s22   ;;  %p1826_p5 = scmp.ne.s32.totalorder (!%p1825_p9), %s1815_s9, 0 }
  0x71   : > { %271 = sbr.rel (%p1825_p9) target bundleno = 1629 (0x65d), region = 40  ;;  %s947_s12 = sshll.u32 (!%p1825_p9), %s1650_s17, 3 }
  0x72   : > { %s274_s15 = scalar_lea.sflag (!%p1825_p9), [#allocation5], %s1650_s17  ;;  %s277_s8 = scalar_lea.vmem (!%p1825_p9), [#allocation4], %s947_s12 }
  0x78   : > { %1341 = dma.done.wait (%p1826_p5), %s274_s15, 128  }
  0x79   : > { %1343 = vsyncadd (%p1826_p5), %s274_s15, 4294967168  ;;  %p1827_p2 = scmp.ne.s32.totalorder %s1813_s7, 0 }
  0x7b   : > { %1345 = dma.done.wait (%p1827_p2), [#allocation8], 1024  }
  0x7c   : > { %1347 = vsyncadd (%p1827_p2), [#allocation8], 4294966272  ;;  %s951_s11 = sshll.u32 %s1650_s17, 4  ;;  %s1663_s13 = scalar_lea.vmem [#allocation10], %s947_s12 }
  0x7d   : > { %s1665_s6 = scalar_lea.vmem [#allocation11], %s951_s11  ;;  %p952_p0 = scmp.ne.s32.totalorder %s1370_s24, 0 }
  0x7e   : > { %v324_v0 = vld [vmem:[#allocation7] sm:$0xff] (!%p952_p0)  ;;  %v325_v1 = vld [vmem:[#allocation7 + $0x8] sm:$0xff] (!%p952_p0)  ;;  %v326_v2 = vld [vmem:[#allocation7 + $0x10] sm:$0xff] (!%p952_p0)  ;;  %v1393_v3 = vmov (!%p952_p0), 0.0|0.0   ;;  %vm1394_vm0 = vmmov (!%p952_p0), 0   ;;  %v1395_v6 = vmov (!%p952_p0), 0.0  }
  0x7f   : > { %322 = sbr.rel (%p952_p0) target bundleno = 486 (0x1e6), region = 56  ;;  %1019 = vmatprep.subr.bf16.mxu0 (!%p952_p0), %v1393_v3  ;;  %v1020_v4 = vpack.c.bf16 (!%p952_p0), %v325_v1, %v324_v0  ;;  %v327_v5 = vld [vmem:[#allocation7 + $0x18] sm:$0xff] (!%p952_p0)  ;;  %995 = vmatprep.mubr.msk.f32.mxu0 (!%p952_p0), %vm1394_vm0, %v1395_v6  ;;  %vm335_vm1 = vcmask (!%p952_p0), 261120   ;;  %v953_v9 = vld [vmem:[%s1798_s2] ss:$0 sm:$0xff] (!%p952_p0)  ;;  %vm416_vm2 = vcmask (!%p952_p0), 64512  }
  0x80   : > { %v1023_v7 = vpack.c.bf16 (!%p952_p0), %v327_v5, %v326_v2  ;;  %v323_v8 = vld [vmem:[%s277_s8] sm:$0xff] (!%p952_p0)  ;;  %s1396_s21 = smov (!%p952_p0), 120   ;;  %s1397_s30 = smov (!%p952_p0), 64  }
  0x81   : > { %1021 = vmatpush3.bf16.msra.mxu0 (!%p952_p0), %v1020_v4  ;;  %s1398_s14 = smov (!%p952_p0), 112   ;;  %s1399_s16 = smov (!%p952_p0), 56  }
  0x82   : > { %1022 = vmatprep.subr.bf16.mxu0 (!%p952_p0), %v1393_v3  ;;  %s1400_s20 = smov (!%p952_p0), 48   ;;  %s1401_s18 = smov (!%p952_p0), 104  }
  0x83   : > { %s1402_s12 = smov (!%p952_p0), 88   ;;  %s1403_s15 = smov (!%p952_p0), 96  }
  0x84   : > { %s1404_s8 = smov (!%p952_p0), 72   ;;  %s1405_s11 = smov (!%p952_p0), 80  }
  0x85   : > { %1024 = vmatpush3.bf16.msra.mxu0 (!%p952_p0), %v1023_v7  ;;  %s1406_s7 = smov (!%p952_p0), 40  }
  0x88   : > { %996 = vmatmul.mubr.msk.f32.vlgmr.msra.gmra.mrb[0].mxu0 %vm335_vm1, %v323_v8 }
 0x15b   : > { %v405_v10 = vpop.f32.mrb[0].mxu0 }
 0x15c   : > { %v406_v11 = vadd.f32 %v953_v9, %v405_v10  ;;  %v997_v12 = vpop.f32.mrb[1].mxu0 }
 0x15e   : > { %955 = vst.msk [vmem:[%s1665_s6 + $0x8] sm:$0xff] %vm335_vm1, %v406_v11  ;;  %427 = vrot.lane.b32.xlu1 %v406_v11, %s1396_s21  ;;  %410 = vrot.lane.b32.xlu0 %v406_v11, %s1397_s30  ;;  %v418_v13 = vmul.f32 0.35355338, %v406_v11 }
 0x15f   : > { %417 = vst.msk [vmem:[#allocation2] sm:$0xff] %vm416_vm2, %v406_v11 }
 0x162   : > { %442 = vrot.lane.b32.xlu1 %v406_v11, %s1398_s14  ;;  %437 = vrot.lane.b32.xlu0 %v406_v11, %s1399_s16 }
 0x166   : > { %452 = vrot.lane.b32.xlu1 %v406_v11, %s1400_s20  ;;  %457 = vrot.lane.b32.xlu0 %v406_v11, %s1401_s18 }
 0x16a   : > { %432 = vrot.lane.b32.xlu1 %v418_v13, %s1402_s12  ;;  %420 = vrot.lane.b32.xlu0 %v418_v13, %s1403_s15 }
 0x16e   : > { %462 = vrot.lane.b32.xlu1 %v418_v13, %s1404_s8  ;;  %447 = vrot.lane.b32.xlu0 %v418_v13, %s1405_s11 }
 0x172   : > { %467 = vrot.lane.b32.xlu0 %v406_v11, %s1406_s7 }
 0x1d0   : > { %v428_v14 = vpop.permute.xlu1 %427  ;;  %v411_v15 = vpop.permute.xlu0 %410 }
 0x1d1   : > { %431 = vst.msk [vmem:[#allocation2 + $0x8] sm:$0xff] %vm416_vm2, %v428_v14  ;;  %426 = vst.msk [vmem:[#allocation2 + $0x40] sm:$0xff] %vm416_vm2, %v411_v15 }
 0x1d2   : > { %413 = vst.msk [vmem:[%s1665_s6] sm:$0xff] %vm335_vm1, %v411_v15 }
 0x1d4   : > { %v443_v16 = vpop.permute.xlu1 %442  ;;  %v438_v17 = vpop.permute.xlu0 %437 }
 0x1d5   : > { %446 = vst.msk [vmem:[#allocation2 + $0x10] sm:$0xff] %vm416_vm2, %v443_v16  ;;  %441 = vst.msk [vmem:[#allocation2 + $0x48] sm:$0xff] %vm416_vm2, %v438_v17 }
 0x1d8   : > { %v453_v18 = vpop.permute.xlu1 %452  ;;  %v458_v19 = vpop.permute.xlu0 %457 }
 0x1d9   : > { %456 = vst.msk [vmem:[#allocation2 + $0x50] sm:$0xff] %vm416_vm2, %v453_v18  ;;  %461 = vst.msk [vmem:[#allocation2 + $0x18] sm:$0xff] %vm416_vm2, %v458_v19 }
 0x1dc   : > { %v433_v20 = vpop.permute.xlu1 %432  ;;  %v421_v21 = vpop.permute.xlu0 %420 }
 0x1dd   : > { %436 = vst.msk [vmem:[#allocation2 + $0x28] sm:$0xff] %vm416_vm2, %v433_v20  ;;  %424 = vst.msk [vmem:[#allocation2 + $0x20] sm:$0xff] %vm416_vm2, %v421_v21 }
 0x1e0   : > { %v463_v22 = vpop.permute.xlu1 %462  ;;  %v448_v23 = vpop.permute.xlu0 %447 }
 0x1e1   : > { %466 = vst.msk [vmem:[#allocation2 + $0x38] sm:$0xff] %vm416_vm2, %v463_v22  ;;  %451 = vst.msk [vmem:[#allocation2 + $0x30] sm:$0xff] %vm416_vm2, %v448_v23 }
 0x1e4   : > { %v468_v24 = vpop.permute.xlu0 %467 }
 0x1e5   : > { %471 = vst.msk [vmem:[#allocation2 + $0x58] sm:$0xff] %vm416_vm2, %v468_v24 }
 0x1e6 PF: > { %s956_s9 = sshll.u32 %s1370_s24, 3  ;;  %vm481_vm3 = vcmask 64512   ;;  %v1407_v25 = vmov 0.0   ;;  %vm1408_vm4 = vmmov 0   ;;  %v558_v28 = vlaneseq  ;;  %p964_p4 = scmp.ne.s32.totalorder %s1370_s24, 3 }
 0x1e7   : > { %998 = vmatprep.subr.mxu0 %v1407_v25  ;;  %1000 = vmatprep.mubr.msk.f32.mxu0 %vm1408_vm4, %v1407_v25  ;;  %s473_s21 = scalar_lea.vmem [#allocation2], %s956_s9  ;;  %s648_s30 = scalar_lea.vmem [#allocation3], %s956_s9  ;;  %v676_v47 = vld [vmem:[#allocation9] sm:$0xff] (!%p964_p4)  ;;  %v1410_v48 = vmov (!%p964_p4), 0.0|0.0   ;;  %v677_v49 = vld [vmem:[#allocation9 + $0x8] sm:$0xff] (!%p964_p4)  ;;  %v678_v50 = vld [vmem:[#allocation9 + $0x10] sm:$0xff] (!%p964_p4) }
 0x1e8   : > { %1003 = vmatprep.subr.mxu1 %v1407_v25  ;;  %1005 = vmatprep.mubr.msk.f32.mxu1 %vm1408_vm4, %v1407_v25  ;;  %v559_v29 = vshrl.u32 %v558_v28, 7  ;;  %v561_v30 = vand.u32 127, %v558_v28  ;;  %s1409_s14 = smov (!%p964_p4), 8   ;;  %s1411_s16 = smov (!%p964_p4), 24   ;;  %v1026_v52 = vpack.c.bf16 (!%p964_p4), %v677_v49, %v676_v47  ;;  %v679_v53 = vld [vmem:[#allocation9 + $0x18] sm:$0xff] (!%p964_p4)  ;;  %vm1412_vm6 = vmmov (!%p964_p4), 0  }
 0x1e9   : > { %v1413_v54 = vmov (!%p964_p4), 0.0   ;;  %v1029_v55 = vpack.c.bf16 (!%p964_p4), %v679_v53, %v678_v50  ;;  %s1414_s24 = smov (!%p964_p4), 16   ;;  %vm672_vm7 = vcmask (!%p964_p4), 130048   ;;  %vm674_vm8 = vcmask (!%p964_p4), 195584   ;;  %v965_v63 = vld [vmem:[%s1800_s4] ss:$0 sm:$0xff] (!%p964_p4) }
 0x1ea   : > { %vm562_vm5 = vcmp.le.s32.totalorder %v561_v30, %v559_v29  ;;  %vm687_vm9 = vcmask (!%p964_p4), 261120  }
 0x1ec   : > { %v960_v26 = vld [vmem:[%s473_s21 + $0x40] sm:$0xff] }
 0x1ed   : > { %999 = vmatpush3.xpose.msk.msra.mxu0 %vm481_vm3, %v960_v26  ;;  %v958_v27 = vld [vmem:[%s473_s21 + $0x20] sm:$0xff] }
 0x1ee   : > { %v474_v40 = vld [vmem:[%s473_s21] sm:$0xff]  ;;  %1025 = vmatprep.subr.bf16.mxu0 (!%p964_p4), %v1410_v48 }
 0x1ef   : > { %1004 = vmatpush3.msra.mxu1 %v474_v40 }
 0x1f0   : > { %1001 = vmatmul.mubr.msk.f32.vlgmr.msra.gmra.mrb[0].mxu0 %vm481_vm3, %v958_v27 }
 0x1f1   : > { %1016 = vmatprep.mubr.msk.f32.mxu0 (!%p964_p4), %vm1412_vm6, %v1413_v54  ;;  %1027 = vmatpush3.bf16.msra.mxu0 (!%p964_p4), %v1026_v52 }
 0x1f2   : > { %1028 = vmatprep.subr.bf16.mxu0 (!%p964_p4), %v1410_v48 }
 0x1f5   : > { %1030 = vmatpush3.bf16.msra.mxu0 (!%p964_p4), %v1029_v55 }
 0x2c3   : > { %v554_v31 = vpop.f32.mrb[0].mxu0 }
 0x2c4   : > { %v563_v32 = vsel %vm562_vm5, %v554_v31, -1e+10  ;;  %v1002_v33 = vpop.f32.mrb[1].mxu0 }
 0x2c5   : > { %v564_v34 = vsel %vm481_vm3, %v563_v32, -inf }
 0x2c6   : > { %565 = vmax.xlane.f32.xlu0 %v564_v34 }
 0x353   : > { %v566_v35 = vpop.xlane.xlu0 %565 }
 0x354   : > { %v567_v36 = vsub.f32 %v563_v32, %v566_v35 }
 0x356   : > { %v568_v37 = vmul.f32 1.442695, %v567_v36 }
 0x358   : > { %1162 = vpow2.f32 %v568_v37 }
 0x362   : > { %v1163_v38 = vpop.eup %1162 }
 0x363   : > { %v570_v39 = vsel %vm481_vm3, %v1163_v38, 0.0 }
 0x364   : > { %571 = vadd.xlane.f32.xlu0 %v570_v39 }
 0x3f1   : > { %v572_v41 = vpop.xlane.xlu0 %571 }
 0x3f2   : > { %1164 = vrcp.f32 %v572_v41 }
 0x3fc   : > { %v1165_v42 = vpop.eup %1164 }
 0x3fd   : > { %v574_v43 = vmul.f32 %v1165_v42, %v1163_v38 }
 0x3ff   : > { %1006 = vmatmul.mubr.msk.f32.vlgmr.msra.gmra.mrb[0].mxu1 %vm481_vm3, %v574_v43 }
 0x4cd   : > { %653 = sbr.rel (%p964_p4) target bundleno = 1579 (0x62b), region = 60 }
 0x4d2   : > { %v644_v44 = vpop.f32.mrb[0].mxu1 }
 0x4d3   : > { %649 = vst.msk [vmem:[%s648_s30] sm:$0xff] %vm481_vm3, %v644_v44  ;;  %v1007_v45 = vpop.f32.mrb[1].mxu1  ;;  %668 = vrot.lane.b32.xlu1 (!%p964_p4), %v644_v44, %s1411_s16 }
 0x4da   : > { %v656_v46 = vld [vmem:[#allocation3 + $0x8] sm:$0xff]  ;;  %v658_v51 = vld [vmem:[#allocation3 + $0x10] sm:$0xff]  ;;  %v654_v57 = vld [vmem:[#allocation3] sm:$0xff] }
 0x4db   : > { %660 = vrot.lane.b32.xlu0 %v656_v46, %s1409_s14 }
 0x4df   : > { %664 = vrot.lane.b32.xlu0 %v658_v51, %s1414_s24 }
 0x545   : > { %v669_v58 = vpop.permute.xlu1 %668 }
 0x54d   : > { %v661_v56 = vpop.permute.xlu0 %660 }
 0x54e   : > { %v671_v59 = vsel %vm481_vm3, %v654_v57, %v661_v56 }
 0x551   : > { %v665_v60 = vpop.permute.xlu0 %664 }
 0x552   : > { %v673_v61 = vsel %vm672_vm7, %v671_v59, %v665_v60 }
 0x553   : > { %v675_v62 = vsel %vm674_vm8, %v673_v61, %v669_v58 }
 0x554   : > { %1017 = vmatmul.mubr.msk.f32.vlgmr.msra.gmra.mrb[0].mxu0 %vm687_vm9, %v675_v62 }
 0x627   : > { %v757_v0 = vpop.f32.mrb[0].mxu0 }
 0x628   : > { %v758_v1 = vadd.f32 %v965_v63, %v757_v0  ;;  %v1018_v2 = vpop.f32.mrb[1].mxu0 }
 0x62a   : > { %761 = vst.msk [vmem:[%s1663_s13] sm:$0xff] %vm687_vm9, %v758_v1 }
 0x62b PF: > { %s969_s12 = sshll.u32 %s1374_s25, 7  ;;  %s781_s7 = sshll.u32 %s1663_s13, 4  ;;  %s1712_s7 = int_to_ptr.vmem [resolvable:$true] %s781_s7 }
 0x62c   : > { %s1709_s11 = scalar_lea.hbm %s1801_s5, %s969_s12  ;;  %s1828_s30 = sld [smem:[#allocation20_spill]] }
 0x62d   : > { %s763_s16 = scalar_lea.sflag [#allocation6], %s1650_s17  ;;  %s1252_s24 = scalar_lea.vmem %s1712_s7, 128 }
 0x62e   : > { %p1253_p10 = scmp.ne.s32.totalorder %s1712_s7, %s1252_s24  ;;  %s1415_s25 = smov [#allocation10]  }
 0x62f   : > { %s1256_s20 = sshll.u32 %s1415_s25, 4  ;;  %s1257_s20 = int_to_ptr.vmem [resolvable:$false] %s1256_s20 }
 0x630   : > { %p1254_p8 = pnand %p1253_p10, %p1595_p6  ;;  %s1258_s13 = scalar_lea.vmem %s1257_s20, 256 }
 0x631   : > { %p1259_p3 = scmp.lt.s32.totalorder %s1712_s7, %s1257_s20  ;;  %p1260_p7 = scmp.lt.s32.totalorder %s1258_s13, %s1252_s24 }
 0x632   : > { %s1717_s14 = scalar_lea.hbm %s1828_s30, %s969_s12  ;;  %p1255_p13 = pneg %p1254_p8 }
 0x633   : > { %p1261_p12 = por %p1260_p7, %p1259_p3 }
 0x635   : > { %p1262_p11 = pnand %p1261_p12, %p1255_p13 }
 0x637   : > { %1265 = shalt.err (!%p1262_p11)
}
 0x638   : > { %s1266_s18 = scalar_lea.hbm %s1709_s11, 128  ;;  %s1270_s8 = scalar_lea.hbm %s1801_s5, 256 }
 0x639   : > { %p1267_p1 = scmp.ne.s32.totalorder %s1709_s11, %s1266_s18  ;;  %p1271_p2 = scmp.lt.u32.totalorder %s1709_s11, %s1801_s5 }
 0x63a   : > { %p1272_p0 = scmp.lt.u32.totalorder %s1270_s8, %s1266_s18  ;;  %p1274_p10 = scmp.lt.u32.totalorder %s1266_s18, %s1709_s11 }
 0x63b   : > { %p1268_p9 = pnand %p1267_p1, %p1595_p6 }
 0x63c   : > { %p1273_p4 = por %p1272_p0, %p1271_p2 }
 0x63d   : > { %p1269_p5 = pneg %p1268_p9 }
 0x63e   : > { %p1275_p8 = por %p1274_p10, %p1273_p4 }
 0x640   : > { %p1276_p13 = pnand %p1275_p8, %p1269_p5 }
 0x642   : > { %1279 = shalt.err (!%p1276_p13)
}
 0x643   : > { %1041 = dma.vmem_to_hbm [thread:$0]  (%p1595_p6), %s1712_s7, 128, %s1709_s11, %s763_s16  }
 0x644   : > { %s793_s24 = sshll.u32 %s1665_s6, 4  ;;  %s768_s25 = scalar_lea.sflag [#allocation12], %s1650_s17  ;;  %s1742_s24 = int_to_ptr.vmem [resolvable:$true] %s793_s24 }
 0x645   : > { %s1280_s20 = scalar_lea.vmem %s1742_s24, 256  ;;  %s1416_s13 = smov [#allocation11]  }
 0x646   : > { %p1281_p3 = scmp.ne.s32.totalorder %s1742_s24, %s1280_s20  ;;  %s1284_s18 = sshll.u32 %s1416_s13, 4  ;;  %s1285_s18 = int_to_ptr.vmem [resolvable:$false] %s1284_s18 }
 0x647   : > { %s1286_s12 = scalar_lea.vmem %s1285_s18, 512  ;;  %p1287_p11 = scmp.lt.s32.totalorder %s1742_s24, %s1285_s18 }
 0x648   : > { %p1282_p7 = pnand %p1281_p3, %p1595_p6  ;;  %p1288_p1 = scmp.lt.s32.totalorder %s1286_s12, %s1280_s20 }
 0x64a   : > { %p1283_p12 = pneg %p1282_p7  ;;  %p1289_p9 = por %p1288_p1, %p1287_p11 }
 0x64c   : > { %p1290_p5 = pnand %p1289_p9, %p1283_p12 }
 0x64e   : > { %1293 = shalt.err (!%p1290_p5)
}
 0x64f   : > { %s1294_s6 = scalar_lea.hbm %s1717_s14, 256  ;;  %s1298_s16 = scalar_lea.hbm %s1828_s30, 512 }
 0x650   : > { %p1295_p2 = scmp.ne.s32.totalorder %s1717_s14, %s1294_s6  ;;  %p1299_p10 = scmp.lt.u32.totalorder %s1717_s14, %s1828_s30 }
 0x651   : > { %p1300_p8 = scmp.lt.u32.totalorder %s1298_s16, %s1294_s6  ;;  %p1302_p3 = scmp.lt.u32.totalorder %s1294_s6, %s1717_s14 }
 0x652   : > { %p1296_p0 = pnand %p1295_p2, %p1595_p6 }
 0x653   : > { %p1301_p13 = por %p1300_p8, %p1299_p10 }
 0x654   : > { %p1297_p4 = pneg %p1296_p0 }
 0x655   : > { %p1303_p7 = por %p1302_p3, %p1301_p13 }
 0x657   : > { %p1304_p12 = pnand %p1303_p7, %p1297_p4 }
 0x659   : > { %1307 = shalt.err (!%p1304_p12)
}
 0x65a   : > { %s1417_s9 = smov 128   ;;  %s1418_s21 = smov 256  }
 0x65b   : > { %s1419_s20 = smov 8  }
 0x65c   : > { %1042 = dma.vmem_to_hbm [thread:$0]  (%p1595_p6), %s1742_s24, 256, %s1717_s14, %s768_s25, %s1417_s9, %s1418_s21, %s1419_s20  }
 0x65d PF: > { %s1829_s13 = sld [smem:[#allocation17_spill]]  ;;  %s1830_s18 = sld [smem:[#allocation18_spill]] }
 0x65e   : > { %p1068_p11 = scmp.ge.s32.totalorder %s1386_s28, 2 }
 0x663   : > { %s808_s12 = sand.u32 1, %s1829_s13   ;;  %p1831_p1 = scmp.ne.s32.totalorder %s1830_s18, 0 }
 0x664   : > { %s809_s6 = scalar_lea.sflag [#allocation6], %s808_s12 }
 0x665   : > { %p1057_p9 = pnand %p1068_p11, %p1831_p1 }
 0x667   : > { %1349 = dma.done.wait (!%p1057_p9), %s809_s6, 128  }
 0x668   : > { %1351 = vsyncadd (!%p1057_p9), %s809_s6, 4294967168  ;;  %s818_s11 = scalar_lea.sflag [#allocation12], %s808_s12 }
 0x669   : > { %1353 = dma.done.wait (!%p1057_p9), %s818_s11, 256  }
 0x66a   : > { %1355 = vsyncadd (!%p1057_p9), %s818_s11, 4294967040  ;;  %s27_s28 = sadd.s32 1, %s1386_s28   ;;  %s1832_s21 = smov %s1362_s22 }
 0x66b   : > { %p24_p5 = scmp.ge.s32.totalorder %s27_s28, 10   ;;  %s1833_s22 = smov %s1366_s23 }
 0x66c   : > { %s1834_s23 = smov %s1618_s1  ;;  %s1835_s24 = smov %s1378_s26 }
 0x66d   : > { %s1836_s25 = smov %s1382_s27  ;;  %s1837_s26 = smov %s1840_s10 }
 0x66e   : > { %s1838_s27 = smov %s1844_s19  ;;  %26 = sbr.rel (!%p24_p5) target bundleno = 13 (0xd), region = 136 }
 0x675   :  { %823 = vsyncpa [#allocation5], 1 }
 0x676   :  { %825 = vsyncpa [#allocation5 + $0x1], 1 }
 0x677   :  { %826 = vsyncpa [#allocation8], 1 }
 0x678   :  { %827 = vsyncpa [#allocation6], 1 }
 0x679   :  { %829 = vsyncpa [#allocation6 + $0x1], 1 }
 0x67a   :  { %830 = vsyncpa [#allocation12], 1 }
 0x67b   :  { %832 = vsyncpa [#allocation12 + $0x1], 1 }

// kernel: tpu_custom_call.1
= control target key start
LH: loop header
LB: loop body
LE: loop exit
PB: predicated region body
PF: predicated region fallthrough
CT: control target
= control target key end

     0   :  { %s1796_s0 = inlined_call_operand.hbm [shape: f32[2,8,32], index: 0, kind: input, shape index: {}]   ;;  %s1797_s1 = inlined_call_operand.hbm [shape: f32[32,96], index: 1, kind: input, shape index: {}]   ;;  %s1798_s2 = inlined_call_operand.vmem [shape: f32[1,96], index: 2, kind: input, shape index: {}]   ;;  %s1799_s3 = inlined_call_operand.hbm [shape: f32[32,32], index: 3, kind: input, shape index: {}]   ;;  %s1800_s4 = inlined_call_operand.vmem [shape: f32[1,32], index: 4, kind: input, shape index: {}]   ;;  %s1801_s5 = inlined_call_operand.hbm [shape: f32[2,8,32], index: 5, kind: output, shape index: {0}]   ;;  %s1802_s6 = inlined_call_operand.hbm [shape: f32[2,2,8,32], index: 6, kind: output, shape index: {1}]  }
   0x1   :  { %1810 = sst [smem:[#allocation19_spill]] %s1797_s1 }
   0x2   :  { %1811 = sst [smem:[#allocation20_spill]] %s1802_s6 }
   0x3   :  { %12 = vsyncpa [#allocation5], 0 }
   0x4   :  { %14 = vsyncpa [#allocation5 + $0x1], 0 }
   0x5   :  { %15 = vsyncpa [#allocation8], 0 }
   0x6   :  { %16 = vsyncpa [#allocation6], 0 }
   0x7   :  { %18 = vsyncpa [#allocation6 + $0x1], 0 }
   0x8   :  { %19 = vsyncpa [#allocation12], 0 }
   0x9   :  { %21 = vsyncpa [#allocation12 + $0x1], 0  ;;  %s1455_s21 = smov 0   ;;  %s1457_s22 = smov 0  }
   0xa   :  { %s1459_s23 = smov 0   ;;  %s1461_s24 = smov 0  }
   0xb   :  { %s1463_s25 = smov 0   ;;  %s1465_s26 = smov 0  }
   0xc   :  { %s1467_s27 = smov 0   ;;  %s1469_s28 = smov 0  }
   0xd LB: > { %1812 = sst [smem:[#allocation17_spill]] %s1358_s21  ;;  %s938_s29 = sadd.s32 4294967295, %s1386_s28   ;;  %s1386_s28 = sphi %s1469_s28, %s27_s28   ;;  %s1382_s27 = sphi %s1467_s27, %s1838_s27   ;;  %s1378_s26 = sphi %s1465_s26, %s1837_s26   ;;  %s1374_s25 = sphi %s1463_s25, %s1836_s25   ;;  %s1370_s24 = sphi %s1461_s24, %s1835_s24   ;;  %s1366_s23 = sphi %s1459_s23, %s1834_s23   ;;  %s1362_s22 = sphi %s1457_s22, %s1833_s22   ;;  %s1358_s21 = sphi %s1455_s21, %s1832_s21  }
   0xe   : > { %s939_s30 = sadd.s32 4294967294, %s1386_s28   ;;  %p59_p0 = scmp.ne.s32.totalorder %s1362_s22, %s1358_s21 }
   0xf   : > { %p1499_p1 = scmp.eq.s32.totalorder %s938_s29, 0  ;;  %p1503_p2 = scmp.eq.s32.totalorder %s938_s29, 7 }
  0x10   : > { %p173_p3 = scmp.eq.s32.totalorder %s939_s30, 7  ;;  %p940_p5 = scmp.ge.s32.totalorder %s1386_s28, 1 }
  0x11   : > { %s1813_s7 = scalar_select %p1499_p1, 1, 0 }
  0x12   : > { %s1814_s8 = scalar_select %p1503_p2, 1, 0 }
  0x13   : > { %p1509_p4 = por %p1499_p1, %p59_p0  ;;  %p1514_p6 = por %p173_p3, %p59_p0 }
  0x14   : > { %p206_p7 = scmp.lt.s32.totalorder %s1386_s28, 9  ;;  %s1388_s12 = smov [#allocation7]  }
  0x15   : > { %s1815_s9 = scalar_select %p1509_p4, 1, 0 }
  0x16   : > { %s1816_s10 = scalar_select %p1514_p6, 1, 0 }
  0x17   : > { %p1519_p8 = pnand %p940_p5, %p206_p7  ;;  %s218_s13 = sshll.u32 %s1388_s12, 4  ;;  %s219_s13 = int_to_ptr.vmem [resolvable:$true] %s218_s13 }
  0x18   : > { %1817 = sst [smem:[#allocation18_spill]] %s1816_s10  ;;  %s1389_s15 = smov [#allocation9]  }
  0x19   : > { %s1818_s11 = scalar_select %p1519_p8, 1, 0 }
  0x1a   : > { %p1045_p9 = pneg %p1519_p8  ;;  %s234_s16 = sshll.u32 %s1389_s15, 4  ;;  %s1531_s16 = int_to_ptr.vmem [resolvable:$true] %s234_s16 }
  0x1b   : > { %s1820_s1 = sld [smem:[#allocation19_spill]] }
  0x1c   : > { %p1527_p10 = pnand %p1045_p9, %p1499_p1 }
  0x1e   : > { %p1168_p12 = pneg %p1527_p10 }
  0x21   : > { %s1166_s19 = scalar_lea.hbm %s1820_s1, 512 }
  0x22   : > { %p1167_p11 = scmp.ne.s32.totalorder %s1820_s1, %s1166_s19  ;;  %p1173_p3 = scmp.lt.u32.totalorder %s1166_s19, %s1820_s1 }
  0x24   : > { %p1169_p13 = pnand %p1168_p12, %p1167_p11 }
  0x26   : > { %p1170_p0 = pneg %p1169_p13 }
  0x28   : > { %p1175_p5 = pnand %p1173_p3, %p1170_p0 }
  0x2a   : > { %1178 = shalt.err (!%p1175_p5)
}
  0x2b   : > { %s1179_s15 = scalar_lea.vmem %s219_s13, 512  ;;  %p1187_p1 = scmp.lt.s32.totalorder %s219_s13, %s219_s13 }
  0x2c   : > { %p1180_p7 = scmp.ne.s32.totalorder %s219_s13, %s1179_s15  ;;  %p1188_p4 = scmp.lt.s32.totalorder %s1179_s15, %s1179_s15 }
  0x2e   : > { %p1182_p9 = pnand %p1180_p7, %p1168_p12  ;;  %p1189_p8 = por %p1188_p4, %p1187_p1 }
  0x30   : > { %p1183_p6 = pneg %p1182_p9 }
  0x32   : > { %p1190_p2 = pnand %p1189_p8, %p1183_p6 }
  0x34   : > { %1193 = shalt.err (!%p1190_p2)
}
  0x35   : > { %s1390_s17 = smov 128   ;;  %s1391_s18 = smov 8  }
  0x36   : > { %1048 = dma.hbm_to_vmem [thread:$0]  (!%p1527_p10), %s1820_s1, 512, %s219_s13, [#allocation8], %s1390_s17, %s1390_s17, %s1391_s18  }
  0x37   : > { %s1194_s12 = scalar_lea.hbm %s1799_s3, 512 }
  0x38   : > { %p1195_p11 = scmp.ne.s32.totalorder %s1799_s3, %s1194_s12  ;;  %p1201_p4 = scmp.lt.u32.totalorder %s1194_s12, %s1799_s3 }
  0x3a   : > { %p1197_p1 = pnand %p1195_p11, %p1168_p12 }
  0x3c   : > { %p1198_p2 = pneg %p1197_p1 }
  0x3e   : > { %p1203_p6 = pnand %p1201_p4, %p1198_p2 }
  0x40   : > { %1206 = shalt.err (!%p1203_p6)
}
  0x41   : > { %s1207_s13 = scalar_lea.vmem %s1531_s16, 512  ;;  %p1215_p3 = scmp.lt.s32.totalorder %s1531_s16, %s1531_s16 }
  0x42   : > { %p1208_p8 = scmp.ne.s32.totalorder %s1531_s16, %s1207_s13  ;;  %p1216_p5 = scmp.lt.s32.totalorder %s1207_s13, %s1207_s13 }
  0x44   : > { %p1210_p13 = pnand %p1208_p8, %p1168_p12  ;;  %p1217_p7 = por %p1216_p5, %p1215_p3 }
  0x46   : > { %p1211_p0 = pneg %p1210_p13 }
  0x48   : > { %p1218_p9 = pnand %p1217_p7, %p1211_p0 }
  0x4a   : > { %1221 = shalt.err (!%p1218_p9)
}
  0x4b   : > { %1051 = dma.hbm_to_vmem [thread:$0]  (!%p1527_p10), %s1799_s3, 512, %s1531_s16, [#allocation8], %s1390_s17, %s1390_s17, %s1391_s18  }
  0x4c   : > { %s36_s10 = sadd.s32 1, %s1378_s26  ;;  %s39_s19 = sadd.s32 1, %s1382_s27 }
  0x4d   : > { %p37_p12 = scmp.ge.s32.totalorder %s36_s10, 4  ;;  %s46_s14 = sadd.s32 1, %s1366_s23 }
  0x4e   : > { %p53_p11 = scmp.ne.s32.totalorder %s1366_s23, %s1362_s22  ;;  %p54_p1 = scmp.eq.s32.totalorder %s1386_s28, 0 }
  0x4f   : > { %s1840_s10 = smov (%p37_p12, %s36_s10), 0  ;;  %s1842_s19 = smov (!%p37_p12, %s39_s19), %s1382_s27 }
  0x50   : > { %p1589_p2 = por %p54_p1, %p53_p11  ;;  %p1822_p4 = scmp.ne.s32.totalorder %s1814_s8, 0 }
  0x51   : > { %p41_p10 = scmp.ge.s32.totalorder %s1842_s19, 2  ;;  %p1065_p8 = scmp.lt.s32.totalorder %s1386_s28, 8 }
  0x52   : > { %p1595_p6 = por %p1822_p4, %p53_p11  ;;  %s251_s16 = sand.u32 1, %s1366_s23  }
  0x53   : > { %s945_s17 = sshll.u32 %s1382_s27, 7  ;;  %s1844_s19 = smov (%p41_p10, %s1842_s19), 0 }
  0x54   : > { %s944_s18 = sshll.u32 %s251_s16, 3  ;;  %s43_s30 = ssub.s32 %s1382_s27, %s1844_s19 }
  0x55   : > { %p44_p13 = scmp.eq.s32.totalorder %s43_s30, 0  ;;  %s1609_s13 = scalar_lea.hbm %s1796_s0, %s945_s17 }
  0x56   : > { %s255_s8 = scalar_lea.vmem [#allocation4], %s944_s18  ;;  %p1613_p0 = pnand %p1065_p8, %p1589_p2 }
  0x57   : > { %s262_s6 = sshll.u32 %s255_s8, 4  ;;  %s252_s30 = scalar_lea.sflag [#allocation5], %s251_s16  ;;  %s1620_s6 = int_to_ptr.vmem [resolvable:$true] %s262_s6 }
  0x58   : > { %s1618_s1 = scalar_select %p44_p13, %s1366_s23, %s46_s14  }
  0x59   : > { %s1222_s17 = scalar_lea.hbm %s1609_s13, 128  ;;  %p1224_p5 = pneg %p1613_p0 }
  0x5a   : > { %p1223_p3 = scmp.ne.s32.totalorder %s1609_s13, %s1222_s17  ;;  %s1227_s12 = scalar_lea.hbm %s1796_s0, 256 }
  0x5b   : > { %p1228_p12 = scmp.lt.u32.totalorder %s1609_s13, %s1796_s0  ;;  %p1229_p11 = scmp.lt.u32.totalorder %s1227_s12, %s1222_s17 }
  0x5c   : > { %p1225_p7 = pnand %p1224_p5, %p1223_p3  ;;  %p1231_p2 = scmp.lt.u32.totalorder %s1222_s17, %s1609_s13 }
  0x5d   : > { %p1230_p1 = por %p1229_p11, %p1228_p12 }
  0x5e   : > { %p1226_p9 = pneg %p1225_p7 }
  0x5f   : > { %p1232_p4 = por %p1231_p2, %p1230_p1 }
  0x61   : > { %p1233_p10 = pnand %p1232_p4, %p1226_p9 }
  0x63   : > { %1236 = shalt.err (!%p1233_p10)
}
  0x64   : > { %s1237_s14 = scalar_lea.vmem %s1620_s6, 128  ;;  %s1392_s16 = smov [#allocation4]  }
  0x65   : > { %p1238_p8 = scmp.ne.s32.totalorder %s1620_s6, %s1237_s14  ;;  %s1242_s20 = sshll.u32 %s1392_s16, 4  ;;  %s1243_s20 = int_to_ptr.vmem [resolvable:$false] %s1242_s20 }
  0x66   : > { %s1244_s18 = scalar_lea.vmem %s1243_s20, 256  ;;  %p1245_p7 = scmp.lt.s32.totalorder %s1620_s6, %s1243_s20 }
  0x67   : > { %p1240_p13 = pnand %p1238_p8, %p1224_p5  ;;  %p1246_p12 = scmp.lt.s32.totalorder %s1244_s18, %s1237_s14 }
  0x69   : > { %p1241_p3 = pneg %p1240_p13  ;;  %p1247_p11 = por %p1246_p12, %p1245_p7 }
  0x6b   : > { %p1248_p1 = pnand %p1247_p11, %p1241_p3 }
  0x6d   : > { %1251 = shalt.err (!%p1248_p1)
}
  0x6e   : > { %1055 = dma.hbm_to_vmem [thread:$0]  (!%p1613_p0), %s1609_s13, 128, %s1620_s6, %s252_s30  }
  0x6f   : > { %p1825_p9 = scmp.ne.s32.totalorder %s1818_s11, 0 }
  0x70   : > { %s1650_s17 = sand.u32 (!%p1825_p9), 1, %s1362_s22   ;;  %p1826_p5 = scmp.ne.s32.totalorder (!%p1825_p9), %s1815_s9, 0 }
  0x71   : > { %271 = sbr.rel (%p1825_p9) target bundleno = 1629 (0x65d), region = 40  ;;  %s947_s12 = sshll.u32 (!%p1825_p9), %s1650_s17, 3 }
  0x72   : > { %s274_s15 = scalar_lea.sflag (!%p1825_p9), [#allocation5], %s1650_s17  ;;  %s277_s8 = scalar_lea.vmem (!%p1825_p9), [#allocation4], %s947_s12 }
  0x78   : > { %1341 = dma.done.wait (%p1826_p5), %s274_s15, 128  }
  0x79   : > { %1343 = vsyncadd (%p1826_p5), %s274_s15, 4294967168  ;;  %p1827_p2 = scmp.ne.s32.totalorder %s1813_s7, 0 }
  0x7b   : > { %1345 = dma.done.wait (%p1827_p2), [#allocation8], 1024  }
  0x7c   : > { %1347 = vsyncadd (%p1827_p2), [#allocation8], 4294966272  ;;  %s951_s11 = sshll.u32 %s1650_s17, 4  ;;  %s1663_s13 = scalar_lea.vmem [#allocation10], %s947_s12 }
  0x7d   : > { %s1665_s6 = scalar_lea.vmem [#allocation11], %s951_s11  ;;  %p952_p0 = scmp.ne.s32.totalorder %s1370_s24, 0 }
  0x7e   : > { %v324_v0 = vld [vmem:[#allocation7] sm:$0xff] (!%p952_p0)  ;;  %v325_v1 = vld [vmem:[#allocation7 + $0x8] sm:$0xff] (!%p952_p0)  ;;  %v326_v2 = vld [vmem:[#allocation7 + $0x10] sm:$0xff] (!%p952_p0)  ;;  %v1393_v3 = vmov (!%p952_p0), 0.0|0.0   ;;  %vm1394_vm0 = vmmov (!%p952_p0), 0   ;;  %v1395_v6 = vmov (!%p952_p0), 0.0  }
  0x7f   : > { %322 = sbr.rel (%p952_p0) target bundleno = 486 (0x1e6), region = 56  ;;  %1019 = vmatprep.subr.bf16.mxu0 (!%p952_p0), %v1393_v3  ;;  %v1020_v4 = vpack.c.bf16 (!%p952_p0), %v325_v1, %v324_v0  ;;  %v327_v5 = vld [vmem:[#allocation7 + $0x18] sm:$0xff] (!%p952_p0)  ;;  %995 = vmatprep.mubr.msk.f32.mxu0 (!%p952_p0), %vm1394_vm0, %v1395_v6  ;;  %vm335_vm1 = vcmask (!%p952_p0), 261120   ;;  %v953_v9 = vld [vmem:[%s1798_s2] ss:$0 sm:$0xff] (!%p952_p0)  ;;  %vm416_vm2 = vcmask (!%p952_p0), 64512  }
  0x80   : > { %v1023_v7 = vpack.c.bf16 (!%p952_p0), %v327_v5, %v326_v2  ;;  %v323_v8 = vld [vmem:[%s277_s8] sm:$0xff] (!%p952_p0)  ;;  %s1396_s21 = smov (!%p952_p0), 120   ;;  %s1397_s30 = smov (!%p952_p0), 64  }
  0x81   : > { %1021 = vmatpush3.bf16.msra.mxu0 (!%p952_p0), %v1020_v4  ;;  %s1398_s14 = smov (!%p952_p0), 112   ;;  %s1399_s16 = smov (!%p952_p0), 56  }
  0x82   : > { %1022 = vmatprep.subr.bf16.mxu0 (!%p952_p0), %v1393_v3  ;;  %s1400_s20 = smov (!%p952_p0), 48   ;;  %s1401_s18 = smov (!%p952_p0), 104  }
  0x83   : > { %s1402_s12 = smov (!%p952_p0), 88   ;;  %s1403_s15 = smov (!%p952_p0), 96  }
  0x84   : > { %s1404_s8 = smov (!%p952_p0), 72   ;;  %s1405_s11 = smov (!%p952_p0), 80  }
  0x85   : > { %1024 = vmatpush3.bf16.msra.mxu0 (!%p952_p0), %v1023_v7  ;;  %s1406_s7 = smov (!%p952_p0), 40  }
  0x88   : > { %996 = vmatmul.mubr.msk.f32.vlgmr.msra.gmra.mrb[0].mxu0 %vm335_vm1, %v323_v8 }
 0x15b   : > { %v405_v10 = vpop.f32.mrb[0].mxu0 }
 0x15c   : > { %v406_v11 = vadd.f32 %v953_v9, %v405_v10  ;;  %v997_v12 = vpop.f32.mrb[1].mxu0 }
 0x15e   : > { %955 = vst.msk [vmem:[%s1665_s6 + $0x8] sm:$0xff] %vm335_vm1, %v406_v11  ;;  %427 = vrot.lane.b32.xlu1 %v406_v11, %s1396_s21  ;;  %410 = vrot.lane.b32.xlu0 %v406_v11, %s1397_s30  ;;  %v418_v13 = vmul.f32 0.35355338, %v406_v11 }
 0x15f   : > { %417 = vst.msk [vmem:[#allocation2] sm:$0xff] %vm416_vm2, %v406_v11 }
 0x162   : > { %442 = vrot.lane.b32.xlu1 %v406_v11, %s1398_s14  ;;  %437 = vrot.lane.b32.xlu0 %v406_v11, %s1399_s16 }
 0x166   : > { %452 = vrot.lane.b32.xlu1 %v406_v11, %s1400_s20  ;;  %457 = vrot.lane.b32.xlu0 %v406_v11, %s1401_s18 }
 0x16a   : > { %432 = vrot.lane.b32.xlu1 %v418_v13, %s1402_s12  ;;  %420 = vrot.lane.b32.xlu0 %v418_v13, %s1403_s15 }
 0x16e   : > { %462 = vrot.lane.b32.xlu1 %v418_v13, %s1404_s8  ;;  %447 = vrot.lane.b32.xlu0 %v418_v13, %s1405_s11 }
 0x172   : > { %467 = vrot.lane.b32.xlu0 %v406_v11, %s1406_s7 }
 0x1d0   : > { %v428_v14 = vpop.permute.xlu1 %427  ;;  %v411_v15 = vpop.permute.xlu0 %410 }
 0x1d1   : > { %431 = vst.msk [vmem:[#allocation2 + $0x8] sm:$0xff] %vm416_vm2, %v428_v14  ;;  %426 = vst.msk [vmem:[#allocation2 + $0x40] sm:$0xff] %vm416_vm2, %v411_v15 }
 0x1d2   : > { %413 = vst.msk [vmem:[%s1665_s6] sm:$0xff] %vm335_vm1, %v411_v15 }
 0x1d4   : > { %v443_v16 = vpop.permute.xlu1 %442  ;;  %v438_v17 = vpop.permute.xlu0 %437 }
 0x1d5   : > { %446 = vst.msk [vmem:[#allocation2 + $0x10] sm:$0xff] %vm416_vm2, %v443_v16  ;;  %441 = vst.msk [vmem:[#allocation2 + $0x48] sm:$0xff] %vm416_vm2, %v438_v17 }
 0x1d8   : > { %v453_v18 = vpop.permute.xlu1 %452  ;;  %v458_v19 = vpop.permute.xlu0 %457 }
 0x1d9   : > { %456 = vst.msk [vmem:[#allocation2 + $0x50] sm:$0xff] %vm416_vm2, %v453_v18  ;;  %461 = vst.msk [vmem:[#allocation2 + $0x18] sm:$0xff] %vm416_vm2, %v458_v19 }
 0x1dc   : > { %v433_v20 = vpop.permute.xlu1 %432  ;;  %v421_v21 = vpop.permute.xlu0 %420 }
 0x1dd   : > { %436 = vst.msk [vmem:[#allocation2 + $0x28] sm:$0xff] %vm416_vm2, %v433_v20  ;;  %424 = vst.msk [vmem:[#allocation2 + $0x20] sm:$0xff] %vm416_vm2, %v421_v21 }
 0x1e0   : > { %v463_v22 = vpop.permute.xlu1 %462  ;;  %v448_v23 = vpop.permute.xlu0 %447 }
 0x1e1   : > { %466 = vst.msk [vmem:[#allocation2 + $0x38] sm:$0xff] %vm416_vm2, %v463_v22  ;;  %451 = vst.msk [vmem:[#allocation2 + $0x30] sm:$0xff] %vm416_vm2, %v448_v23 }
 0x1e4   : > { %v468_v24 = vpop.permute.xlu0 %467 }
 0x1e5   : > { %471 = vst.msk [vmem:[#allocation2 + $0x58] sm:$0xff] %vm416_vm2, %v468_v24 }
 0x1e6 PF: > { %s956_s9 = sshll.u32 %s1370_s24, 3  ;;  %vm481_vm3 = vcmask 64512   ;;  %v1407_v25 = vmov 0.0   ;;  %vm1408_vm4 = vmmov 0   ;;  %v558_v28 = vlaneseq  ;;  %p964_p4 = scmp.ne.s32.totalorder %s1370_s24, 3 }
 0x1e7   : > { %998 = vmatprep.subr.mxu0 %v1407_v25  ;;  %1000 = vmatprep.mubr.msk.f32.mxu0 %vm1408_vm4, %v1407_v25  ;;  %s473_s21 = scalar_lea.vmem [#allocation2], %s956_s9  ;;  %s648_s30 = scalar_lea.vmem [#allocation3], %s956_s9  ;;  %v676_v47 = vld [vmem:[#allocation9] sm:$0xff] (!%p964_p4)  ;;  %v1410_v48 = vmov (!%p964_p4), 0.0|0.0   ;;  %v677_v49 = vld [vmem:[#allocation9 + $0x8] sm:$0xff] (!%p964_p4)  ;;  %v678_v50 = vld [vmem:[#allocation9 + $0x10] sm:$0xff] (!%p964_p4) }
 0x1e8   : > { %1003 = vmatprep.subr.mxu1 %v1407_v25  ;;  %1005 = vmatprep.mubr.msk.f32.mxu1 %vm1408_vm4, %v1407_v25  ;;  %v559_v29 = vshrl.u32 %v558_v28, 7  ;;  %v561_v30 = vand.u32 127, %v558_v28  ;;  %s1409_s14 = smov (!%p964_p4), 8   ;;  %s1411_s16 = smov (!%p964_p4), 24   ;;  %v1026_v52 = vpack.c.bf16 (!%p964_p4), %v677_v49, %v676_v47  ;;  %v679_v53 = vld [vmem:[#allocation9 + $0x18] sm:$0xff] (!%p964_p4)  ;;  %vm1412_vm6 = vmmov (!%p964_p4), 0  }
 0x1e9   : > { %v1413_v54 = vmov (!%p964_p4), 0.0   ;;  %v1029_v55 = vpack.c.bf16 (!%p964_p4), %v679_v53, %v678_v50  ;;  %s1414_s24 = smov (!%p964_p4), 16   ;;  %vm672_vm7 = vcmask (!%p964_p4), 130048   ;;  %vm674_vm8 = vcmask (!%p964_p4), 195584   ;;  %v965_v63 = vld [vmem:[%s1800_s4] ss:$0 sm:$0xff] (!%p964_p4) }
 0x1ea   : > { %vm562_vm5 = vcmp.le.s32.totalorder %v561_v30, %v559_v29  ;;  %vm687_vm9 = vcmask (!%p964_p4), 261120  }
 0x1ec   : > { %v960_v26 = vld [vmem:[%s473_s21 + $0x40] sm:$0xff] }
 0x1ed   : > { %999 = vmatpush3.xpose.msk.msra.mxu0 %vm481_vm3, %v960_v26  ;;  %v958_v27 = vld [vmem:[%s473_s21 + $0x20] sm:$0xff] }
 0x1ee   : > { %v474_v40 = vld [vmem:[%s473_s21] sm:$0xff]  ;;  %1025 = vmatprep.subr.bf16.mxu0 (!%p964_p4), %v1410_v48 }
 0x1ef   : > { %1004 = vmatpush3.msra.mxu1 %v474_v40 }
 0x1f0   : > { %1001 = vmatmul.mubr.msk.f32.vlgmr.msra.gmra.mrb[0].mxu0 %vm481_vm3, %v958_v27 }
 0x1f1   : > { %1016 = vmatprep.mubr.msk.f32.mxu0 (!%p964_p4), %vm1412_vm6, %v1413_v54  ;;  %1027 = vmatpush3.bf16.msra.mxu0 (!%p964_p4), %v1026_v52 }
 0x1f2   : > { %1028 = vmatprep.subr.bf16.mxu0 (!%p964_p4), %v1410_v48 }
 0x1f5   : > { %1030 = vmatpush3.bf16.msra.mxu0 (!%p964_p4), %v1029_v55 }
 0x2c3   : > { %v554_v31 = vpop.f32.mrb[0].mxu0 }
 0x2c4   : > { %v563_v32 = vsel %vm562_vm5, %v554_v31, -1e+10  ;;  %v1002_v33 = vpop.f32.mrb[1].mxu0 }
 0x2c5   : > { %v564_v34 = vsel %vm481_vm3, %v563_v32, -inf }
 0x2c6   : > { %565 = vmax.xlane.f32.xlu0 %v564_v34 }
 0x353   : > { %v566_v35 = vpop.xlane.xlu0 %565 }
 0x354   : > { %v567_v36 = vsub.f32 %v563_v32, %v566_v35 }
 0x356   : > { %v568_v37 = vmul.f32 1.442695, %v567_v36 }
 0x358   : > { %1162 = vpow2.f32 %v568_v37 }
 0x362   : > { %v1163_v38 = vpop.eup %1162 }
 0x363   : > { %v570_v39 = vsel %vm481_vm3, %v1163_v38, 0.0 }
 0x364   : > { %571 = vadd.xlane.f32.xlu0 %v570_v39 }
 0x3f1   : > { %v572_v41 = vpop.xlane.xlu0 %571 }
 0x3f2   : > { %1164 = vrcp.f32 %v572_v41 }
 0x3fc   : > { %v1165_v42 = vpop.eup %1164 }
 0x3fd   : > { %v574_v43 = vmul.f32 %v1165_v42, %v1163_v38 }
 0x3ff   : > { %1006 = vmatmul.mubr.msk.f32.vlgmr.msra.gmra.mrb[0].mxu1 %vm481_vm3, %v574_v43 }
 0x4cd   : > { %653 = sbr.rel (%p964_p4) target bundleno = 1579 (0x62b), region = 60 }
 0x4d2   : > { %v644_v44 = vpop.f32.mrb[0].mxu1 }
 0x4d3   : > { %649 = vst.msk [vmem:[%s648_s30] sm:$0xff] %vm481_vm3, %v644_v44  ;;  %v1007_v45 = vpop.f32.mrb[1].mxu1  ;;  %668 = vrot.lane.b32.xlu1 (!%p964_p4), %v644_v44, %s1411_s16 }
 0x4da   : > { %v656_v46 = vld [vmem:[#allocation3 + $0x8] sm:$0xff]  ;;  %v658_v51 = vld [vmem:[#allocation3 + $0x10] sm:$0xff]  ;;  %v654_v57 = vld [vmem:[#allocation3] sm:$0xff] }
 0x4db   : > { %660 = vrot.lane.b32.xlu0 %v656_v46, %s1409_s14 }
 0x4df   : > { %664 = vrot.lane.b32.xlu0 %v658_v51, %s1414_s24 }
 0x545   : > { %v669_v58 = vpop.permute.xlu1 %668 }
 0x54d   : > { %v661_v56 = vpop.permute.xlu0 %660 }
 0x54e   : > { %v671_v59 = vsel %vm481_vm3, %v654_v57, %v661_v56 }
 0x551   : > { %v665_v60 = vpop.permute.xlu0 %664 }
 0x552   : > { %v673_v61 = vsel %vm672_vm7, %v671_v59, %v665_v60 }
 0x553   : > { %v675_v62 = vsel %vm674_vm8, %v673_v61, %v669_v58 }
 0x554   : > { %1017 = vmatmul.mubr.msk.f32.vlgmr.msra.gmra.mrb[0].mxu0 %vm687_vm9, %v675_v62 }
 0x627   : > { %v757_v0 = vpop.f32.mrb[0].mxu0 }
 0x628   : > { %v758_v1 = vadd.f32 %v965_v63, %v757_v0  ;;  %v1018_v2 = vpop.f32.mrb[1].mxu0 }
 0x62a   : > { %761 = vst.msk [vmem:[%s1663_s13] sm:$0xff] %vm687_vm9, %v758_v1 }
 0x62b PF: > { %s969_s12 = sshll.u32 %s1374_s25, 7  ;;  %s781_s7 = sshll.u32 %s1663_s13, 4  ;;  %s1712_s7 = int_to_ptr.vmem [resolvable:$true] %s781_s7 }
 0x62c   : > { %s1709_s11 = scalar_lea.hbm %s1801_s5, %s969_s12  ;;  %s1828_s30 = sld [smem:[#allocation20_spill]] }
 0x62d   : > { %s763_s16 = scalar_lea.sflag [#allocation6], %s1650_s17  ;;  %s1252_s24 = scalar_lea.vmem %s1712_s7, 128 }
 0x62e   : > { %p1253_p10 = scmp.ne.s32.totalorder %s1712_s7, %s1252_s24  ;;  %s1415_s25 = smov [#allocation10]  }
 0x62f   : > { %s1256_s20 = sshll.u32 %s1415_s25, 4  ;;  %s1257_s20 = int_to_ptr.vmem [resolvable:$false] %s1256_s20 }
 0x630   : > { %p1254_p8 = pnand %p1253_p10, %p1595_p6  ;;  %s1258_s13 = scalar_lea.vmem %s1257_s20, 256 }
 0x631   : > { %p1259_p3 = scmp.lt.s32.totalorder %s1712_s7, %s1257_s20  ;;  %p1260_p7 = scmp.lt.s32.totalorder %s1258_s13, %s1252_s24 }
 0x632   : > { %s1717_s14 = scalar_lea.hbm %s1828_s30, %s969_s12  ;;  %p1255_p13 = pneg %p1254_p8 }
 0x633   : > { %p1261_p12 = por %p1260_p7, %p1259_p3 }
 0x635   : > { %p1262_p11 = pnand %p1261_p12, %p1255_p13 }
 0x637   : > { %1265 = shalt.err (!%p1262_p11)
}
 0x638   : > { %s1266_s18 = scalar_lea.hbm %s1709_s11, 128  ;;  %s1270_s8 = scalar_lea.hbm %s1801_s5, 256 }
 0x639   : > { %p1267_p1 = scmp.ne.s32.totalorder %s1709_s11, %s1266_s18  ;;  %p1271_p2 = scmp.lt.u32.totalorder %s1709_s11, %s1801_s5 }
 0x63a   : > { %p1272_p0 = scmp.lt.u32.totalorder %s1270_s8, %s1266_s18  ;;  %p1274_p10 = scmp.lt.u32.totalorder %s1266_s18, %s1709_s11 }
 0x63b   : > { %p1268_p9 = pnand %p1267_p1, %p1595_p6 }
 0x63c   : > { %p1273_p4 = por %p1272_p0, %p1271_p2 }
 0x63d   : > { %p1269_p5 = pneg %p1268_p9 }
 0x63e   : > { %p1275_p8 = por %p1274_p10, %p1273_p4 }
 0x640   : > { %p1276_p13 = pnand %p1275_p8, %p1269_p5 }
 0x642   : > { %1279 = shalt.err (!%p1276_p13)
}
 0x643   : > { %1041 = dma.vmem_to_hbm [thread:$0]  (%p1595_p6), %s1712_s7, 128, %s1709_s11, %s763_s16  }
 0x644   : > { %s793_s24 = sshll.u32 %s1665_s6, 4  ;;  %s768_s25 = scalar_lea.sflag [#allocation12], %s1650_s17  ;;  %s1742_s24 = int_to_ptr.vmem [resolvable:$true] %s793_s24 }
 0x645   : > { %s1280_s20 = scalar_lea.vmem %s1742_s24, 256  ;;  %s1416_s13 = smov [#allocation11]  }
 0x646   : > { %p1281_p3 = scmp.ne.s32.totalorder %s1742_s24, %s1280_s20  ;;  %s1284_s18 = sshll.u32 %s1416_s13, 4  ;;  %s1285_s18 = int_to_ptr.vmem [resolvable:$false] %s1284_s18 }
 0x647   : > { %s1286_s12 = scalar_lea.vmem %s1285_s18, 512  ;;  %p1287_p11 = scmp.lt.s32.totalorder %s1742_s24, %s1285_s18 }
 0x648   : > { %p1282_p7 = pnand %p1281_p3, %p1595_p6  ;;  %p1288_p1 = scmp.lt.s32.totalorder %s1286_s12, %s1280_s20 }
 0x64a   : > { %p1283_p12 = pneg %p1282_p7  ;;  %p1289_p9 = por %p1288_p1, %p1287_p11 }
 0x64c   : > { %p1290_p5 = pnand %p1289_p9, %p1283_p12 }
 0x64e   : > { %1293 = shalt.err (!%p1290_p5)
}
 0x64f   : > { %s1294_s6 = scalar_lea.hbm %s1717_s14, 256  ;;  %s1298_s16 = scalar_lea.hbm %s1828_s30, 512 }
 0x650   : > { %p1295_p2 = scmp.ne.s32.totalorder %s1717_s14, %s1294_s6  ;;  %p1299_p10 = scmp.lt.u32.totalorder %s1717_s14, %s1828_s30 }
 0x651   : > { %p1300_p8 = scmp.lt.u32.totalorder %s1298_s16, %s1294_s6  ;;  %p1302_p3 = scmp.lt.u32.totalorder %s1294_s6, %s1717_s14 }
 0x652   : > { %p1296_p0 = pnand %p1295_p2, %p1595_p6 }
 0x653   : > { %p1301_p13 = por %p1300_p8, %p1299_p10 }
 0x654   : > { %p1297_p4 = pneg %p1296_p0 }
 0x655   : > { %p1303_p7 = por %p1302_p3, %p1301_p13 }
 0x657   : > { %p1304_p12 = pnand %p1303_p7, %p1297_p4 }
 0x659   : > { %1307 = shalt.err (!%p1304_p12)
}
 0x65a   : > { %s1417_s9 = smov 128   ;;  %s1418_s21 = smov 256  }
 0x65b   : > { %s1419_s20 = smov 8  }
 0x65c   : > { %1042 = dma.vmem_to_hbm [thread:$0]  (%p1595_p6), %s1742_s24, 256, %s1717_s14, %s768_s25, %s1417_s9, %s1418_s21, %s1419_s20  }
 0x65d PF: > { %s1829_s13 = sld [smem:[#allocation17_spill]]  ;;  %s1830_s18 = sld [smem:[#allocation18_spill]] }
 0x65e   : > { %p1068_p11 = scmp.ge.s32.totalorder %s1386_s28, 2 }
 0x663   : > { %s808_s12 = sand.u32 1, %s1829_s13   ;;  %p1831_p1 = scmp.ne.s32.totalorder %s1830_s18, 0 }
 0x664   : > { %s809_s6 = scalar_lea.sflag [#allocation6], %s808_s12 }
 0x665   : > { %p1057_p9 = pnand %p1068_p11, %p1831_p1 }
 0x667   : > { %1349 = dma.done.wait (!%p1057_p9), %s809_s6, 128  }
 0x668   : > { %1351 = vsyncadd (!%p1057_p9), %s809_s6, 4294967168  ;;  %s818_s11 = scalar_lea.sflag [#allocation12], %s808_s12 }
 0x669   : > { %1353 = dma.done.wait (!%p1057_p9), %s818_s11, 256  }
 0x66a   : > { %1355 = vsyncadd (!%p1057_p9), %s818_s11, 4294967040  ;;  %s27_s28 = sadd.s32 1, %s1386_s28   ;;  %s1832_s21 = smov %s1362_s22 }
 0x66b   : > { %p24_p5 = scmp.ge.s32.totalorder %s27_s28, 10   ;;  %s1833_s22 = smov %s1366_s23 }
 0x66c   : > { %s1834_s23 = smov %s1618_s1  ;;  %s1835_s24 = smov %s1378_s26 }
 0x66d   : > { %s1836_s25 = smov %s1382_s27  ;;  %s1837_s26 = smov %s1840_s10 }
 0x66e   : > { %s1838_s27 = smov %s1844_s19  ;;  %26 = sbr.rel (!%p24_p5) target bundleno = 13 (0xd), region = 136 }
 0x675   :  { %823 = vsyncpa [#allocation5], 1 }
 0x676   :  { %825 = vsyncpa [#allocation5 + $0x1], 1 }
 0x677   :  { %826 = vsyncpa [#allocation8], 1 }
 0x678   :  { %827 = vsyncpa [#allocation6], 1 }
 0x679   :  { %829 = vsyncpa [#allocation6 + $0x1], 1 }
 0x67a   :  { %830 = vsyncpa [#allocation12], 1 }
 0x67b   :  { %832 = vsyncpa [#allocation12 + $0x1], 1 }

</bundles_post_ra>
